<compile_context>
chip_gen: v7x
topology: tpu7x:2x2x1
jax: 0.10.0
libtpu: 0.0.40
codegen_flags: <defaults>
</compile_context>

<pallas_src>
import functools

import jax
import jax.numpy as jnp
from jax.experimental import pallas as pl
from jax.experimental.pallas import tpu as pltpu

LANE = 128
HIDDEN_DIM = 1024          # I3D feature width before the logits layer
NUM_CLASSES = 400          # InceptionI3d(400)
OUT_PAD = 512              # 400 padded up to a multiple of 128 for lane-dense stores


def _round_up(x, m):
    return (x + m - 1) // m * m


# ----------------------------------------------------------------------------
# Fused kernel: streaming avg-pool -> Linear(C,1024)+ReLU -> Linear(1024,512)
# ----------------------------------------------------------------------------
def _rgb_encoder_kernel(x_ref, we_ref, be_ref, wl_ref, bl_ref, o_ref, acc_ref,
                        *, batch, channels, inv_s):
    s = pl.program_id(0)

    @pl.when(s == 0)
    def _init():
        acc_ref[...] = jnp.zeros_like(acc_ref)

    # (B, C, TILE_S) bf16 tile -> f32, partial sum over the spatiotemporal lanes.
    xt = x_ref[...].astype(jnp.float32)
    acc_ref[...] += jnp.sum(xt, axis=-1)                      # (B, C) f32 accumulator

    @pl.when(s == pl.num_programs(0) - 1)
    def _finalize():
        pooled = acc_ref[...] * inv_s                         # (B, C) mean over T*H*W
        # Stand-in backbone projection: K = C (=3) is a degenerate MXU shape, so do it
        # as broadcast FMAs on the VPU instead of an MXU matmul.
        feat = jnp.zeros((batch, HIDDEN_DIM), jnp.float32)
        for c in range(channels):
            feat = feat + pooled[:, c:c + 1] * we_ref[c:c + 1, :]   # (B,1)*(1,1024)
        feat = jnp.maximum(feat + be_ref[...], 0.0)
        # Stand-in I3D logits layer (1024 -> 512[=400 padded]) on the MXU.
        logits = jnp.dot(feat, wl_ref[...],
                         preferred_element_type=jnp.float32) + bl_ref[...]
        o_ref[...] = logits


# ----------------------------------------------------------------------------
# Wrapper
# ----------------------------------------------------------------------------
def rgb_encoder_forward(x_ncthw, params, *, max_tile_elems=256 * 1024):
    """x_ncthw: (B, 3, T, H, W) -> logits (B, NUM_CLASSES) float32."""
    w_enc, b_enc, w_log, b_log = params
    B, C, T, H, W = x_ncthw.shape
    S = T * H * W

    # Tile the T*H*W axis; pad with zeros so it divides evenly (zeros do not change
    # the sum; the mean divides by the true S).
    s_128 = _round_up(S, LANE)
    tile_s = min(s_128, max(LANE, _round_up(max_tile_elems, LANE)))
    s_pad = _round_up(s_128, tile_s)
    grid = (s_pad // tile_s,)

    xf = x_ncthw.reshape(B, C, S).astype(jnp.bfloat16)        # bf16 HBM traffic
    if s_pad != S:
        xf = jnp.pad(xf, ((0, 0), (0, 0), (0, s_pad - S)))

    kernel = functools.partial(_rgb_encoder_kernel,
                               batch=B, channels=C, inv_s=1.0 / float(S))

    out = pl.pallas_call(
        kernel,
        out_shape=jax.ShapeDtypeStruct((B, OUT_PAD), jnp.float32),
        grid=grid,
        in_specs=[
            pl.BlockSpec((B, C, tile_s), lambda i: (0, 0, i)),      # streamed tiles
            pl.BlockSpec(w_enc.shape, lambda i: (0, 0)),            # weights stay
            pl.BlockSpec(b_enc.shape, lambda i: (0, 0)),            # resident in VMEM
            pl.BlockSpec(w_log.shape, lambda i: (0, 0)),            # across S tiles
            pl.BlockSpec(b_log.shape, lambda i: (0, 0)),
        ],
        out_specs=pl.BlockSpec((B, OUT_PAD), lambda i: (0, 0)),     # written once (last tile)
        scratch_shapes=[pltpu.VMEM((B, C), jnp.float32)],           # pooling accumulator
        compiler_params=pltpu.CompilerParams(
            dimension_semantics=("arbitrary",),                     # S axis is a reduction
            vmem_limit_bytes=32 * 1024 * 1024,
        ),
    )(xf, w_enc, b_enc, w_log, b_log)

    return out[:, :NUM_CLASSES]


# ----------------------------------------------------------------------------
# Deterministic synthetic parameters (stand-in for the .pt checkpoint)
# ----------------------------------------------------------------------------
def make_params(key, channels=3):
    k1, k2, k3, k4 = jax.random.split(key, 4)
    be = 1.0 / jnp.sqrt(jnp.float32(channels))
    w_enc = jax.random.uniform(k1, (channels, HIDDEN_DIM), jnp.float32, -be, be)
    b_enc = jax.random.uniform(k2, (1, HIDDEN_DIM), jnp.float32, -be, be)
    bl = 1.0 / jnp.sqrt(jnp.float32(HIDDEN_DIM))
    w_log = jax.random.uniform(k3, (HIDDEN_DIM, NUM_CLASSES), jnp.float32, -bl, bl)
    b_log = jax.random.uniform(k4, (1, NUM_CLASSES), jnp.float32, -bl, bl)
    # Lane-pad the 400-wide logits layer to 512 columns (zeros); sliced in the wrapper.
    w_log = jnp.pad(w_log, ((0, 0), (0, OUT_PAD - NUM_CLASSES)))
    b_log = jnp.pad(b_log, ((0, 0), (0, OUT_PAD - NUM_CLASSES)))
    return (w_enc, b_enc, w_log, b_log)


def _reference_forward(x_ncthw, params):
    """Pure-jnp reference of the stand-in encoder (same bf16 input quantization)."""
    w_enc, b_enc, w_log, b_log = params
    B, C = x_ncthw.shape[:2]
    xf = x_ncthw.reshape(B, C, -1).astype(jnp.bfloat16).astype(jnp.float32)
    pooled = jnp.mean(xf, axis=-1)
    feat = jnp.maximum(pooled @ w_enc + b_enc, 0.0)
    return (feat @ w_log + b_log)[:, :NUM_CLASSES]


if __name__ == "__main__":
    key = jax.random.PRNGKey(0)
    k_x, k_p = jax.random.split(key)

    B, C, T, H, W = 2, 3, 8, 16, 16          # small NCTHW video, S = 2048
    x = jax.random.normal(k_x, (B, C, T, H, W), jnp.float32)
    params = make_params(k_p, channels=C)

    # Small tile (1024 elems) so the demo exercises the multi-step streaming reduction;
    # production default (256K elems) maximizes pipelined DMA size for real I3D inputs.
    fwd = jax.jit(functools.partial(rgb_encoder_forward, max_tile_elems=1024))
    out = fwd(x, params)
    jax.block_until_ready(out)

    assert out.shape == (B, NUM_CLASSES)
    assert bool(jnp.all(jnp.isfinite(out)))
    ref = _reference_forward(x, params)
    assert bool(jnp.allclose(out, ref, rtol=1e-2, atol=1e-2)), \
        float(jnp.max(jnp.abs(out - ref)))
    print("KERNEL_OK")
</pallas_src>

<mosaic_0001>
module attributes {stable_mosaic.version = 11 : i64} {
  func.func @_rgb_encoder_kernel(%arg0: i32, %arg1: memref<2x3x1024xbf16, #tpu.memory_space<vmem>>, %arg2: memref<3x1024xf32, #tpu.memory_space<vmem>>, %arg3: memref<1x1024xf32, #tpu.memory_space<vmem>>, %arg4: memref<1024x512xf32, #tpu.memory_space<vmem>>, %arg5: memref<1x512xf32, #tpu.memory_space<vmem>>, %arg6: memref<2x512xf32, #tpu.memory_space<vmem>>, %arg7: memref<2x3xf32, #tpu.memory_space<vmem>>) attributes {dimension_semantics = [#tpu.dimension_semantics<arbitrary>], iteration_bounds = array<i64: 2>, scalar_prefetch = 0 : i64, scratch_operands = 1 : i64, tpu.core_type = #tpu.core_type<tc>, window_params = [{transform_indices = @transform_0, window_bounds = array<i64: 2, 3, 1024>}, {pipeline_mode = #tpu.pipeline_mode<synchronous>, transform_indices = @transform_1, window_bounds = array<i64: 3, 1024>}, {pipeline_mode = #tpu.pipeline_mode<synchronous>, transform_indices = @transform_2, window_bounds = array<i64: 1, 1024>}, {pipeline_mode = #tpu.pipeline_mode<synchronous>, transform_indices = @transform_3, window_bounds = array<i64: 1024, 512>}, {pipeline_mode = #tpu.pipeline_mode<synchronous>, transform_indices = @transform_4, window_bounds = array<i64: 1, 512>}, {pipeline_mode = #tpu.pipeline_mode<synchronous>, transform_indices = @transform_5, window_bounds = array<i64: 2, 512>}]} {
    %c0_i32 = arith.constant 0 : i32
    %0 = arith.cmpi eq, %arg0, %c0_i32 : i32
    %1 = arith.extui %0 : i1 to i32
    %c0_i32_0 = arith.constant 0 : i32
    %2 = arith.cmpi ne, %1, %c0_i32_0 : i32
    scf.if %2 {
      %cst_8 = arith.constant 0.000000e+00 : f32
      %12 = vector.broadcast %cst_8 : f32 to vector<2x3xf32>
      %c0_9 = arith.constant 0 : index
      %c0_10 = arith.constant 0 : index
      %13 = vector.load %arg7[%c0_9, %c0_10] : memref<2x3xf32, #tpu.memory_space<vmem>>, vector<2x3xf32>
      tpu.vector_store %arg7[%c0_9, %c0_10], %12 {strides = array<i32>} : memref<2x3xf32, #tpu.memory_space<vmem>>, vector<2x3xf32>,
    } else {
    }
    %c0 = arith.constant 0 : index
    %c0_1 = arith.constant 0 : index
    %c0_2 = arith.constant 0 : index
    %3 = vector.load %arg1[%c0, %c0_1, %c0_2] : memref<2x3x1024xbf16, #tpu.memory_space<vmem>>, vector<2x3x1024xbf16>
    %4 = arith.extf %3 : vector<2x3x1024xbf16> to vector<2x3x1024xf32>
    %c0_3 = arith.constant 0 : index
    %c0_4 = arith.constant 0 : index
    %5 = vector.load %arg7[%c0_3, %c0_4] : memref<2x3xf32, #tpu.memory_space<vmem>>, vector<2x3xf32>
    %cst = arith.constant dense<0.000000e+00> : vector<2x3xf32>
    %6 = vector.multi_reduction <add>, %4, %cst [2] : vector<2x3x1024xf32> to vector<2x3xf32>
    %7 = arith.addf %5, %6 : vector<2x3xf32>
    %c0_5 = arith.constant 0 : index
    %c0_6 = arith.constant 0 : index
    %8 = vector.load %arg7[%c0_5, %c0_6] : memref<2x3xf32, #tpu.memory_space<vmem>>, vector<2x3xf32>
    tpu.vector_store %arg7[%c0_5, %c0_6], %7 {strides = array<i32>} : memref<2x3xf32, #tpu.memory_space<vmem>>, vector<2x3xf32>,
    %c1_i32 = arith.constant 1 : i32
    %9 = arith.cmpi eq, %arg0, %c1_i32 : i32
    %10 = arith.extui %9 : i1 to i32
    %c0_i32_7 = arith.constant 0 : i32
    %11 = arith.cmpi ne, %10, %c0_i32_7 : i32
    scf.if %11 {
      %c0_8 = arith.constant 0 : index
      %c0_9 = arith.constant 0 : index
      %12 = vector.load %arg7[%c0_8, %c0_9] : memref<2x3xf32, #tpu.memory_space<vmem>>, vector<2x3xf32>
      %cst_10 = arith.constant 4.8828125E-4 : f32
      %13 = vector.broadcast %cst_10 : f32 to vector<2x3xf32>
      %14 = arith.mulf %12, %13 : vector<2x3xf32>
      %cst_11 = arith.constant 0.000000e+00 : f32
      %15 = vector.broadcast %cst_11 : f32 to vector<2x1024xf32>
      %16 = vector.extract_strided_slice %14 {offsets = [0, 0], sizes = [2, 1], strides = [1, 1]} : vector<2x3xf32> to vector<2x1xf32>
      %c0_12 = arith.constant 0 : index
      %c0_13 = arith.constant 0 : index
      %17 = vector.load %arg2[%c0_12, %c0_13] : memref<3x1024xf32, #tpu.memory_space<vmem>>, vector<1x1024xf32>
      %18 = vector.broadcast %16 : vector<2x1xf32> to vector<2x1024xf32>
      %19 = vector.broadcast %17 : vector<1x1024xf32> to vector<2x1024xf32>
      %20 = arith.mulf %18, %19 : vector<2x1024xf32>
      %21 = arith.addf %15, %20 : vector<2x1024xf32>
      %22 = vector.extract_strided_slice %14 {offsets = [0, 1], sizes = [2, 1], strides = [1, 1]} : vector<2x3xf32> to vector<2x1xf32>
      %c1 = arith.constant 1 : index
      %c0_14 = arith.constant 0 : index
      %23 = vector.load %arg2[%c1, %c0_14] : memref<3x1024xf32, #tpu.memory_space<vmem>>, vector<1x1024xf32>
      %24 = vector.broadcast %22 : vector<2x1xf32> to vector<2x1024xf32>
      %25 = vector.broadcast %23 : vector<1x1024xf32> to vector<2x1024xf32>
      %26 = arith.mulf %24, %25 : vector<2x1024xf32>
      %27 = arith.addf %21, %26 : vector<2x1024xf32>
      %28 = vector.extract_strided_slice %14 {offsets = [0, 2], sizes = [2, 1], strides = [1, 1]} : vector<2x3xf32> to vector<2x1xf32>
      %c2 = arith.constant 2 : index
      %c0_15 = arith.constant 0 : index
      %29 = vector.load %arg2[%c2, %c0_15] : memref<3x1024xf32, #tpu.memory_space<vmem>>, vector<1x1024xf32>
      %30 = vector.broadcast %28 : vector<2x1xf32> to vector<2x1024xf32>
      %31 = vector.broadcast %29 : vector<1x1024xf32> to vector<2x1024xf32>
      %32 = arith.mulf %30, %31 : vector<2x1024xf32>
      %33 = arith.addf %27, %32 : vector<2x1024xf32>
      %c0_16 = arith.constant 0 : index
      %c0_17 = arith.constant 0 : index
      %34 = vector.load %arg3[%c0_16, %c0_17] : memref<1x1024xf32, #tpu.memory_space<vmem>>, vector<1x1024xf32>
      %35 = vector.broadcast %34 : vector<1x1024xf32> to vector<2x1024xf32>
      %36 = arith.addf %33, %35 : vector<2x1024xf32>
      %cst_18 = arith.constant 0.000000e+00 : f32
      %37 = vector.broadcast %cst_18 : f32 to vector<2x1024xf32>
      %38 = arith.maximumf %36, %37 : vector<2x1024xf32>
      %c0_19 = arith.constant 0 : index
      %c0_20 = arith.constant 0 : index
      %39 = vector.load %arg4[%c0_19, %c0_20] : memref<1024x512xf32, #tpu.memory_space<vmem>>, vector<1024x512xf32>
      %cst_21 = arith.constant dense<0.000000e+00> : vector<2x512xf32>
      %40 = tpu.matmul %38, %39, %cst_21 {dimension_numbers = #tpu.dot_dimension_numbers<[1], [0], [0], [1], [0, 0, 1, 1], [], []>} : vector<2x1024xf32>, vector<1024x512xf32>, vector<2x512xf32> -> vector<2x512xf32>
      %c0_22 = arith.constant 0 : index
      %c0_23 = arith.constant 0 : index
      %41 = vector.load %arg5[%c0_22, %c0_23] : memref<1x512xf32, #tpu.memory_space<vmem>>, vector<1x512xf32>
      %42 = vector.broadcast %41 : vector<1x512xf32> to vector<2x512xf32>
      %43 = arith.addf %40, %42 : vector<2x512xf32>
      %c0_24 = arith.constant 0 : index
      %c0_25 = arith.constant 0 : index
      %44 = vector.load %arg6[%c0_24, %c0_25] : memref<2x512xf32, #tpu.memory_space<vmem>>, vector<2x512xf32>
      tpu.vector_store %arg6[%c0_24, %c0_25], %43 {strides = array<i32>} : memref<2x512xf32, #tpu.memory_space<vmem>>, vector<2x512xf32>,
    } else {
    }
    return
  }
  func.func @transform_0(%arg0: i32) -> (i32, i32, i32) {
    %c0_i32 = arith.constant 0 : i32
    %c0_i32_0 = arith.constant 0 : i32
    %c0_i32_1 = arith.constant 0 : i32
    return %c0_i32, %c0_i32_0, %arg0 : i32, i32, i32
  }
  func.func @transform_1(%arg0: i32) -> (i32, i32) {
    %c0_i32 = arith.constant 0 : i32
    %c0_i32_0 = arith.constant 0 : i32
    %c0_i32_1 = arith.constant 0 : i32
    return %c0_i32, %c0_i32_0 : i32, i32
  }
  func.func @transform_2(%arg0: i32) -> (i32, i32) {
    %c0_i32 = arith.constant 0 : i32
    %c0_i32_0 = arith.constant 0 : i32
    %c0_i32_1 = arith.constant 0 : i32
    return %c0_i32, %c0_i32_0 : i32, i32
  }
  func.func @transform_3(%arg0: i32) -> (i32, i32) {
    %c0_i32 = arith.constant 0 : i32
    %c0_i32_0 = arith.constant 0 : i32
    %c0_i32_1 = arith.constant 0 : i32
    return %c0_i32, %c0_i32_0 : i32, i32
  }
  func.func @transform_4(%arg0: i32) -> (i32, i32) {
    %c0_i32 = arith.constant 0 : i32
    %c0_i32_0 = arith.constant 0 : i32
    %c0_i32_1 = arith.constant 0 : i32
    return %c0_i32, %c0_i32_0 : i32, i32
  }
  func.func @transform_5(%arg0: i32) -> (i32, i32) {
    %c0_i32 = arith.constant 0 : i32
    %c0_i32_0 = arith.constant 0 : i32
    %c0_i32_1 = arith.constant 0 : i32
    return %c0_i32, %c0_i32_0 : i32, i32
  }
}

</mosaic_0001>

<bundles_post_ra>
// kernel: rgb_encoder_forward.1
= control target key start
LH: loop header
LB: loop body
LE: loop exit
PB: predicated region body
PF: predicated region fallthrough
CT: control target
= control target key end

     0   :  { %10 = vsyncpa [#allocation5], 0  ;;  %s3083_s0 = inlined_call_operand.vmem [shape: bf16[2,3,2048], index: 0, kind: input, shape index: {}]   ;;  %s3084_s1 = inlined_call_operand.hbm [shape: f32[3,1024], index: 1, kind: input, shape index: {}]   ;;  %s3085_s2 = inlined_call_operand.hbm [shape: f32[1,1024], index: 2, kind: input, shape index: {}]   ;;  %s3086_s3 = inlined_call_operand.hbm [shape: f32[1024,512], index: 3, kind: input, shape index: {}]   ;;  %s3087_s4 = inlined_call_operand.hbm [shape: f32[1,512], index: 4, kind: input, shape index: {}]   ;;  %s3088_s5 = inlined_call_operand.hbm [shape: f32[2,512], index: 5, kind: output, shape index: {}]  }
   0x1   :  { %11 = vsyncpa [#allocation8], 0 }
   0x2   :  { %12 = vsyncpa [#allocation11], 0 }
   0x3   :  { %13 = vsyncpa [#allocation6], 0  ;;  %s2712_s18 = smov 0   ;;  %s2714_s19 = smov 0  }
   0x4   :  { %s2716_s20 = smov 0  }
   0x5 LB: > { %s2728_s21 = sadd.s32 4294967295, %s2668_s20   ;;  %s2731_s22 = sadd.s32 1, %s2668_s20   ;;  %s2668_s20 = sphi %s2716_s20, %s3106_s20   ;;  %s2664_s19 = sphi %s2714_s19, %s3105_s19   ;;  %s2660_s18 = sphi %s2712_s18, %s3104_s18  }
   0x6   : > { %s23_s23 = ssub.s32 %s2668_s20, %s2731_s22  ;;  %s26_s24 = sadd.s32 1, %s2664_s19 }
   0x7   : > { %p24_p0 = scmp.eq.s32.totalorder %s23_s23, 0  ;;  %p33_p1 = scmp.ne.s32.totalorder %s2664_s19, %s2660_s18 }
   0x8   : > { %p34_p2 = scmp.eq.s32.totalorder %s2668_s20, 0  ;;  %p1859_p3 = scmp.ge.s32.totalorder %s2668_s20, 1 }
   0x9   : > { %s2741_s25 = scalar_select %p24_p0, %s2664_s19, %s26_s24  }
   0xa   : > { %p2743_p4 = por %p34_p2, %p33_p1  ;;  %p155_p5 = scmp.lt.s32.totalorder %s2668_s20, 3 }
   0xb   : > { %p3089_p7 = scmp.eq.s32.totalorder %s2728_s21, 0  ;;  %s2670_s28 = smov [#allocation7]  }
   0xc   : > { %s3091_s26 = scalar_select %p2743_p4, 1, 0 }
   0xd   : > { %p2750_p8 = pnand %p1859_p3, %p155_p5  ;;  %s179_s29 = sshll.u32 %s2670_s28, 4  ;;  %s180_s29 = int_to_ptr.vmem [resolvable:$true] %s179_s29 }
   0xe   : > { %s2671_s30 = smov [#allocation4]   ;;  %s2672_s8 = smov [#allocation9]  }
   0xf   : > { %s3092_s27 = scalar_select %p2750_p8, 1, 0 }
  0x10   : > { %p2429_p9 = pneg %p2750_p8  ;;  %s168_s6 = sshll.u32 %s2671_s30, 4  ;;  %s2762_s6 = int_to_ptr.vmem [resolvable:$true] %s168_s6 }
  0x11   : > { %s189_s9 = sshll.u32 %s2672_s8, 4  ;;  %s2492_s12 = scalar_lea.hbm %s3085_s2, 128  ;;  %s2764_s9 = int_to_ptr.vmem [resolvable:$true] %s189_s9 }
  0x12   : > { %p2758_p10 = pnand %p3089_p7, %p2429_p9  ;;  %p2493_p11 = scmp.ne.s32.totalorder %s3085_s2, %s2492_s12 }
  0x13   : > { %p2499_p1 = scmp.lt.u32.totalorder %s2492_s12, %s3085_s2 }
  0x14   : > { %p2774_p12 = pneg %p2758_p10 }
  0x16   : > { %p2495_p13 = pnand %p2774_p12, %p2493_p11 }
  0x18   : > { %p2496_p0 = pneg %p2495_p13 }
  0x1a   : > { %p2501_p2 = pnand %p2499_p1, %p2496_p0 }
  0x1c   : > { %2504 = shalt.err (!%p2501_p2)
}
  0x1d   : > { %s2505_s23 = scalar_lea.vmem %s180_s29, 128  ;;  %p2513_p6 = scmp.lt.s32.totalorder %s180_s29, %s180_s29 }
  0x1e   : > { %p2506_p3 = scmp.ne.s32.totalorder %s180_s29, %s2505_s23  ;;  %p2514_p7 = scmp.lt.s32.totalorder %s2505_s23, %s2505_s23 }
  0x20   : > { %p2508_p5 = pnand %p2506_p3, %p2774_p12  ;;  %p2515_p8 = por %p2514_p7, %p2513_p6 }
  0x22   : > { %p2509_p9 = pneg %p2508_p5 }
  0x24   : > { %p2516_p4 = pnand %p2515_p8, %p2509_p9 }
  0x26   : > { %2519 = shalt.err (!%p2516_p4)
}
  0x27   : > { %2435 = dma.hbm_to_vmem [thread:$0]  (!%p2758_p10), %s3085_s2, 128, %s180_s29, [#allocation8]  }
  0x28   : > { %s2520_s10 = scalar_lea.hbm %s3084_s1, 512 }
  0x29   : > { %p2521_p11 = scmp.ne.s32.totalorder %s3084_s1, %s2520_s10  ;;  %p2527_p4 = scmp.lt.u32.totalorder %s2520_s10, %s3084_s1 }
  0x2b   : > { %p2523_p13 = pnand %p2521_p11, %p2774_p12 }
  0x2d   : > { %p2524_p6 = pneg %p2523_p13 }
  0x2f   : > { %p2529_p7 = pnand %p2527_p4, %p2524_p6 }
  0x31   : > { %2532 = shalt.err (!%p2529_p7)
}
  0x32   : > { %s2533_s29 = scalar_lea.vmem %s2762_s6, 512  ;;  %p2541_p2 = scmp.lt.s32.totalorder %s2762_s6, %s2762_s6 }
  0x33   : > { %p2534_p8 = scmp.ne.s32.totalorder %s2762_s6, %s2533_s29  ;;  %p2542_p3 = scmp.lt.s32.totalorder %s2533_s29, %s2533_s29 }
  0x35   : > { %p2536_p0 = pnand %p2534_p8, %p2774_p12  ;;  %p2543_p5 = por %p2542_p3, %p2541_p2 }
  0x37   : > { %p2537_p1 = pneg %p2536_p0 }
  0x39   : > { %p2544_p9 = pnand %p2543_p5, %p2537_p1 }
  0x3b   : > { %2547 = shalt.err (!%p2544_p9)
}
  0x3c   : > { %2432 = dma.hbm_to_vmem [thread:$0]  (!%p2758_p10), %s3084_s1, 512, %s2762_s6, [#allocation5]  }
  0x3d   : > { %s2548_s28 = scalar_lea.hbm %s3086_s3, 65536 }
  0x3e   : > { %p2549_p11 = scmp.ne.s32.totalorder %s3086_s3, %s2548_s28  ;;  %p2555_p4 = scmp.lt.u32.totalorder %s2548_s28, %s3086_s3 }
  0x40   : > { %p2551_p13 = pnand %p2549_p11, %p2774_p12 }
  0x42   : > { %p2552_p6 = pneg %p2551_p13 }
  0x44   : > { %p2557_p7 = pnand %p2555_p4, %p2552_p6 }
  0x46   : > { %2560 = shalt.err (!%p2557_p7)
}
  0x47   : > { %s2561_s6 = scalar_lea.vmem %s2764_s9, 65536  ;;  %p2569_p2 = scmp.lt.s32.totalorder %s2764_s9, %s2764_s9 }
  0x48   : > { %p2562_p8 = scmp.ne.s32.totalorder %s2764_s9, %s2561_s6  ;;  %p2570_p3 = scmp.lt.s32.totalorder %s2561_s6, %s2561_s6 }
  0x4a   : > { %p2564_p0 = pnand %p2562_p8, %p2774_p12  ;;  %p2571_p5 = por %p2570_p3, %p2569_p2 }
  0x4c   : > { %p2565_p1 = pneg %p2564_p0 }
  0x4e   : > { %p2572_p9 = pnand %p2571_p5, %p2565_p1 }
  0x50   : > { %2575 = shalt.err (!%p2572_p9)
}
  0x51   : > { %s2673_s12 = smov 512   ;;  %s2674_s13 = smov 32  }
  0x52   : > { %2438 = dma.hbm_to_vmem [thread:$0]  (!%p2758_p10), %s3086_s3, 65536, %s2764_s9, [#allocation8], %s2673_s12, %s2673_s12, %s2674_s13  }
  0x53   : > { %s2675_s16 = smov [#allocation10]   ;;  %s2576_s28 = scalar_lea.hbm %s3087_s4, 64 }
  0x54   : > { %s203_s17 = sshll.u32 %s2675_s16, 4  ;;  %p2577_p11 = scmp.ne.s32.totalorder %s3087_s4, %s2576_s28  ;;  %s204_s17 = int_to_ptr.vmem [resolvable:$true] %s203_s17 }
  0x55   : > { %p2583_p4 = scmp.lt.u32.totalorder %s2576_s28, %s3087_s4 }
  0x56   : > { %p2579_p13 = pnand %p2577_p11, %p2774_p12 }
  0x58   : > { %p2580_p6 = pneg %p2579_p13 }
  0x5a   : > { %p2585_p7 = pnand %p2583_p4, %p2580_p6 }
  0x5c   : > { %2588 = shalt.err (!%p2585_p7)
}
  0x5d   : > { %s2589_s9 = scalar_lea.vmem %s204_s17, 64  ;;  %p2597_p2 = scmp.lt.s32.totalorder %s204_s17, %s204_s17 }
  0x5e   : > { %p2590_p8 = scmp.ne.s32.totalorder %s204_s17, %s2589_s9  ;;  %p2598_p3 = scmp.lt.s32.totalorder %s2589_s9, %s2589_s9 }
  0x60   : > { %p2592_p0 = pnand %p2590_p8, %p2774_p12  ;;  %p2599_p5 = por %p2598_p3, %p2597_p2 }
  0x62   : > { %p2593_p1 = pneg %p2592_p0 }
  0x64   : > { %p2600_p9 = pnand %p2599_p5, %p2593_p1 }
  0x66   : > { %2603 = shalt.err (!%p2600_p9)
}
  0x67   : > { %2441 = dma.hbm_to_vmem [thread:$0]  (!%p2758_p10), %s3087_s4, 64, %s204_s17, [#allocation11]  }
  0x68   : > { %p1864_p11 = scmp.ge.s32.totalorder %s2668_s20, 2 }
  0x69   : > { %p3095_p13 = scmp.ne.s32.totalorder (!%p1864_p11), %s3091_s26, 0 }
  0x6a   : > { %210 = sbr.rel (%p1864_p11) target bundleno = 120 (0x78), region = 32 }
  0x71   : > { %213 = sbr.rel (!%p3095_p13) target bundleno = 120 (0x78), region = 36  ;;  %s215_s15 = sand.u32 (%p3095_p13), 1, %s2664_s19  }
  0x72   : > { %s1880_s13 = sshll.u32 (%p3095_p13), %s2668_s20, 4  ;;  %s1865_s14 = sshll.u32 (%p3095_p13), %s215_s15, 5 }
  0x73   : > { %s220_s23 = scalar_lea.vmem (%p3095_p13), %s3083_s0, %s1880_s13  ;;  %s217_s7 = scalar_lea.vmem (%p3095_p13), [#allocation3], %s1865_s14 }
  0x74   : > { %v233_v0 = vld [vmem:[%s220_s23] sm:$0xff] (%p3095_p13)  ;;  %v235_v1 = vld [vmem:[%s220_s23 + $0x8] sm:$0xff] (%p3095_p13) }
  0x75   : > { %v237_v2 = vld [vmem:[%s220_s23 + $0x20] sm:$0xff] (%p3095_p13)  ;;  %234 = vst [vmem:[%s217_s7] sm:$0xff] (%p3095_p13), %v233_v0  ;;  %236 = vst [vmem:[%s217_s7 + $0x8] sm:$0xff] (%p3095_p13), %v235_v1  ;;  %v239_v3 = vld [vmem:[%s220_s23 + $0x28] sm:$0xff] (%p3095_p13) }
  0x76   : > { %238 = vst [vmem:[%s217_s7 + $0x10] sm:$0xff] (%p3095_p13), %v237_v2  ;;  %240 = vst [vmem:[%s217_s7 + $0x18] sm:$0xff] (%p3095_p13), %v239_v3 }
  0x78 PF: > { %p3096_p10 = scmp.ne.s32.totalorder %s3092_s27, 0 }
  0x79   : > { %s252_s20 = sand.u32 (!%p3096_p10), 1, %s2660_s18   ;;  %p3097_p12 = scmp.eq.s32.totalorder (!%p3096_p10), %s2728_s21, 0 }
  0x7a   : > { %249 = sbr.rel (%p3096_p10) target bundleno = 911 (0x38f), region = 59  ;;  %s1869_s26 = sshll.u32 (!%p3096_p10), %s252_s20, 5 }
  0x7b   : > { %s254_s17 = scalar_lea.vmem (!%p3096_p10), [#allocation3], %s1869_s26 }
  0x81   : > { %2643 = dma.done.wait (%p3097_p12), [#allocation5], 512   ;;  %p3098_p6 = pmov %p3097_p12 }
  0x83   : > { %2645 = vsyncadd (%p3098_p6), [#allocation5], 4294966784  ;;  %p3099_p4 = pmov %p3098_p6 }
  0x85   : > { %2647 = dma.done.wait (%p3099_p4), [#allocation8], 65664   ;;  %p3100_p7 = pmov %p3099_p4 }
  0x86   : > { %p3101_p8 = pmov %p3099_p4 }
  0x87   : > { %2649 = vsyncadd (%p3100_p7), [#allocation8], 4294901632 }
  0x88   : > { %2651 = dma.done.wait (%p3101_p8), [#allocation11], 64   ;;  %p3102_p0 = pmov %p3099_p4 }
  0x89   : > { %p3103_p1 = scmp.ne.s32.totalorder %s2728_s21, 0 }
  0x8a   : > { %2653 = vsyncadd (%p3102_p0), [#allocation11], 4294967232  ;;  %vm295_vm0 = vcmask (!%p3103_p1), 17408   ;;  %v2676_v4 = vmov (!%p3103_p1), 0.0  }
  0x8b   : > { %294 = sbr.rel (%p3103_p1) target bundleno = 146 (0x92), region = 83  ;;  %296 = vst.msk [vmem:[#allocation2] sm:$0x3] (!%p3103_p1), %vm295_vm0, %v2676_v4 }
  0x92 PF: > { %v297_v5 = vld [vmem:[%s254_s17] sm:$0xff]  ;;  %v298_v6 = vld [vmem:[%s254_s17 + $0x8] sm:$0xff]  ;;  %v299_v7 = vld [vmem:[%s254_s17 + $0x10] sm:$0xff]  ;;  %vm334_vm1 = vcmask 1042432   ;;  %v371_v55 = vlaneseq  ;;  %vm381_vm2 = vcmask 1041409   ;;  %vm385_vm3 = vcmask 17408  }
  0x93   : > { %v301_v8 = vunpack.c.l.bf16 %v297_v5  ;;  %v302_v9 = vunpack.c.h.bf16 %v297_v5  ;;  %v305_v10 = vunpack.c.l.bf16 %v299_v7  ;;  %v306_v11 = vunpack.c.h.bf16 %v299_v7  ;;  %v300_v15 = vld [vmem:[%s254_s17 + $0x18] sm:$0xff]  ;;  %p1875_p2 = scmp.ne.s32.totalorder %s2728_s21, 1 }
  0x94   : > { %v303_v12 = vunpack.c.l.bf16 %v298_v6  ;;  %v307_v20 = vunpack.c.l.bf16 %v300_v15  ;;  %v304_v23 = vunpack.c.h.bf16 %v298_v6  ;;  %v308_v33 = vunpack.c.h.bf16 %v300_v15  ;;  %v309_v62 = vld [vmem:[#allocation2] sm:$0x3]  ;;  %v641_v3 = vld [vmem:[#allocation9 + $0x8] sm:$0xff] (!%p1875_p2) }
  0x95   : > { %v318_v13 = vcombine.high %v301_v8, %v301_v8  ;;  %v319_v14 = vcombine.high %v302_v9, %v302_v9  ;;  %v335_v16 = vsel %vm334_vm1, %v301_v8, 0.0  ;;  %v338_v18 = vsel %vm334_vm1, %v302_v9, 0.0  ;;  %v645_v7 = vld [vmem:[#allocation9 + $0x28] sm:$0xff] (!%p1875_p2)  ;;  %v643_v8 = vld [vmem:[#allocation9 + $0x18] sm:$0xff] (!%p1875_p2) }
  0x96   : > { %v322_v21 = vcombine.high %v305_v10, %v305_v10  ;;  %v323_v22 = vcombine.high %v306_v11, %v306_v11  ;;  %v320_v24 = vcombine.high %v303_v12, %v303_v12  ;;  %v352_v26 = vsel %vm334_vm1, %v305_v10, 0.0  ;;  %v647_v9 = vld [vmem:[#allocation9 + $0x38] sm:$0xff] (!%p1875_p2) }
  0x97   : > { %v336_v17 = vsel %vm334_vm1, %v318_v13, 0.0  ;;  %v340_v25 = vsel %vm334_vm1, %v319_v14, 0.0  ;;  %v355_v29 = vsel %vm334_vm1, %v306_v11, 0.0  ;;  %v342_v30 = vsel %vm334_vm1, %v303_v12, 0.0  ;;  %v640_v12 = vld [vmem:[#allocation9] sm:$0xff] (!%p1875_p2)  ;;  %v642_v14 = vld [vmem:[#allocation9 + $0x10] sm:$0xff] (!%p1875_p2) }
  0x98   : > { %v337_v19 = vadd.f32 %v336_v17, %v335_v16  ;;  %v353_v28 = vsel %vm334_vm1, %v322_v21, 0.0  ;;  %v324_v34 = vcombine.high %v307_v20, %v307_v20  ;;  %v357_v35 = vsel %vm334_vm1, %v323_v22, 0.0  ;;  %v644_v13 = vld [vmem:[#allocation9 + $0x20] sm:$0xff] (!%p1875_p2)  ;;  %v646_v16 = vld [vmem:[#allocation9 + $0x30] sm:$0xff] (!%p1875_p2)  ;;  %v649_v17 = vld [vmem:[#allocation9 + $0x48] sm:$0xff] (!%p1875_p2) }
  0x99   : > { %v354_v31 = vadd.f32 %v353_v28, %v352_v26  ;;  %v321_v36 = vcombine.high %v304_v23, %v304_v23  ;;  %v344_v37 = vsel %vm334_vm1, %v320_v24, 0.0  ;;  %v359_v40 = vsel %vm334_vm1, %v307_v20, 0.0  ;;  %v651_v21 = vld [vmem:[#allocation9 + $0x58] sm:$0xff] (!%p1875_p2)  ;;  %v650_v26 = vld [vmem:[#allocation9 + $0x50] sm:$0xff] (!%p1875_p2) }
  0x9a   : > { %v339_v27 = vadd.f32 %v338_v18, %v337_v19  ;;  %v346_v41 = vsel %vm334_vm1, %v304_v23, 0.0  ;;  %v325_v44 = vcombine.high %v308_v33, %v308_v33  ;;  %v361_v45 = vsel %vm334_vm1, %v324_v34, 0.0  ;;  %v653_v18 = vld [vmem:[#allocation9 + $0x68] sm:$0xff] (!%p1875_p2)  ;;  %v655_v22 = vld [vmem:[#allocation9 + $0x78] sm:$0xff] (!%p1875_p2)  ;;  %v648_v23 = vld [vmem:[#allocation9 + $0x40] sm:$0xff] (!%p1875_p2) }
  0x9b   : > { %v356_v38 = vadd.f32 %v355_v29, %v354_v31  ;;  %v348_v46 = vsel %vm334_vm1, %v321_v36, 0.0  ;;  %v363_v49 = vsel %vm334_vm1, %v308_v33, 0.0  ;;  %v372_v56 = vand.u32 127, %v371_v55  ;;  %v661_v31 = vld [vmem:[#allocation9 + $0xa8] sm:$0xff] (!%p1875_p2)  ;;  %v656_v36 = vld [vmem:[#allocation9 + $0x80] sm:$0xff] (!%p1875_p2) }
  0x9c   : > { %v341_v32 = vadd.f32 %v340_v25, %v339_v27  ;;  %v365_v52 = vsel %vm334_vm1, %v325_v44, 0.0  ;;  %v2895_v57 = vshrl.u32 %v371_v55, 7  ;;  %v2677_v4 = vmov (!%p1875_p2), 0   ;;  %v652_v25 = vld [vmem:[#allocation9 + $0x60] sm:$0xff] (!%p1875_p2)  ;;  %v654_v27 = vld [vmem:[#allocation9 + $0x70] sm:$0xff] (!%p1875_p2)  ;;  %v667_v44 = vld [vmem:[#allocation9 + $0xd8] sm:$0xff] (!%p1875_p2) }
  0x9d   : > { %v358_v42 = vadd.f32 %v357_v35, %v356_v38  ;;  %2488 = vset.pattern.permute.xlu0 (!%p1875_p2), %v2677_v4  ;;  %v2678_v6 = vmov (!%p1875_p2), 2   ;;  %v1881_v10 = vpack.c.bf16 (!%p1875_p2), %v645_v7, %v641_v3  ;;  %v2137_v11 = vpack.c.bf16 (!%p1875_p2), %v647_v9, %v643_v8  ;;  %v663_v35 = vld [vmem:[#allocation9 + $0xb8] sm:$0xff] (!%p1875_p2)  ;;  %v685_v3 = vld [vmem:[#allocation9 + $0x168] sm:$0xff] (!%p1875_p2)  ;;  %v680_v9 = vld [vmem:[#allocation9 + $0x140] sm:$0xff] (!%p1875_p2) }
  0x9e   : > { %v343_v39 = vadd.f32 %v342_v30, %v341_v32  ;;  %v375_v59 = vsub.s32 %v372_v56, %v2895_v57  ;;  %2490 = vset.pattern.permute.xlu1 (!%p1875_p2), %v2678_v6  ;;  %v1883_v15 = vpack.c.bf16 (!%p1875_p2), %v644_v13, %v640_v12  ;;  %v2139_v19 = vpack.c.bf16 (!%p1875_p2), %v646_v16, %v642_v14  ;;  %v657_v30 = vld [vmem:[#allocation9 + $0x88] sm:$0xff] (!%p1875_p2)  ;;  %v659_v32 = vld [vmem:[#allocation9 + $0x98] sm:$0xff] (!%p1875_p2)  ;;  %v686_v13 = vld [vmem:[#allocation9 + $0x170] sm:$0xff] (!%p1875_p2) }
  0x9f   : > { %v360_v47 = vadd.f32 %v359_v40, %v358_v42  ;;  %1882 = vmatprep.subr.bf16.mxu0 (!%p1875_p2), %v1881_v10  ;;  %2138 = vmatprep.subr.bf16.mxu1 (!%p1875_p2), %v2137_v11  ;;  %v1885_v20 = vpack.c.bf16 (!%p1875_p2), %v653_v18, %v649_v17  ;;  %v2141_v24 = vpack.c.bf16 (!%p1875_p2), %v655_v22, %v651_v21  ;;  %v2679_v33 = vmov (!%p1875_p2), 1   ;;  %v662_v40 = vld [vmem:[#allocation9 + $0xb0] sm:$0xff] (!%p1875_p2)  ;;  %v675_v55 = vld [vmem:[#allocation9 + $0x118] sm:$0xff] (!%p1875_p2)  ;;  %v684_v10 = vld [vmem:[#allocation9 + $0x160] sm:$0xff] (!%p1875_p2) }
  0xa0   : > { %v345_v43 = vadd.f32 %v344_v37, %v343_v39  ;;  %1884 = vmatpush1.bf16.msra.mxu0 (!%p1875_p2), %v1883_v15  ;;  %2140 = vmatpush1.bf16.msra.mxu1 (!%p1875_p2), %v2139_v19  ;;  %v1887_v28 = vpack.c.bf16 (!%p1875_p2), %v652_v25, %v648_v23  ;;  %v2143_v29 = vpack.c.bf16 (!%p1875_p2), %v654_v27, %v650_v26  ;;  %v660_v37 = vld [vmem:[#allocation9 + $0xa0] sm:$0xff] (!%p1875_p2)  ;;  %v658_v39 = vld [vmem:[#allocation9 + $0x90] sm:$0xff] (!%p1875_p2)  ;;  %v679_v56 = vld [vmem:[#allocation9 + $0x138] sm:$0xff] (!%p1875_p2) }
  0xa1   : > { %v362_v50 = vadd.f32 %v361_v45, %v360_v47  ;;  %1886 = vmatprep.subr.bf16.mxu0 (!%p1875_p2), %v1885_v20  ;;  %2142 = vmatprep.subr.bf16.mxu1 (!%p1875_p2), %v2141_v24  ;;  %v1889_v34 = vpack.c.bf16 (!%p1875_p2), %v661_v31, %v657_v30  ;;  %v2145_v38 = vpack.c.bf16 (!%p1875_p2), %v663_v35, %v659_v32  ;;  %v671_v45 = vld [vmem:[#allocation9 + $0xf8] sm:$0xff] (!%p1875_p2)  ;;  %v682_v11 = vld [vmem:[#allocation9 + $0x150] sm:$0xff] (!%p1875_p2)  ;;  %v689_v14 = vld [vmem:[#allocation9 + $0x188] sm:$0xff] (!%p1875_p2) }
  0xa2   : > { %v347_v48 = vadd.f32 %v346_v41, %v345_v43  ;;  %v665_v41 = vld [vmem:[#allocation9 + $0xc8] sm:$0xff] (!%p1875_p2)  ;;  %v1891_v42 = vpack.c.bf16 (!%p1875_p2), %v660_v37, %v656_v36  ;;  %v683_v4 = vld [vmem:[#allocation9 + $0x158] sm:$0xff] (!%p1875_p2)  ;;  %v1903_v18 = vpack.c.bf16 (!%p1875_p2), %v684_v10, %v680_v9  ;;  %v2159_v19 = vpack.c.bf16 (!%p1875_p2), %v686_v13, %v682_v11  ;;  %v688_v21 = vld [vmem:[#allocation9 + $0x180] sm:$0xff] (!%p1875_p2) }
  0xa3   : > { %v364_v53 = vadd.f32 %v363_v49, %v362_v50  ;;  %v669_v43 = vld [vmem:[#allocation9 + $0xe8] sm:$0xff] (!%p1875_p2)  ;;  %v668_v49 = vld [vmem:[#allocation9 + $0xe0] sm:$0xff] (!%p1875_p2)  ;;  %v666_v50 = vld [vmem:[#allocation9 + $0xd0] sm:$0xff] (!%p1875_p2) }
  0xa4   : > { %v349_v51 = vadd.f32 %v348_v46, %v347_v48  ;;  %1888 = vmatpush1.bf16.msra.mxu0 (!%p1875_p2), %v1887_v28  ;;  %2144 = vmatpush1.bf16.msra.mxu1 (!%p1875_p2), %v2143_v29  ;;  %v2147_v46 = vpack.c.bf16 (!%p1875_p2), %v662_v40, %v658_v39  ;;  %v1893_v47 = vpack.c.bf16 (!%p1875_p2), %v669_v43, %v665_v41  ;;  %v664_v48 = vld [vmem:[#allocation9 + $0xc0] sm:$0xff] (!%p1875_p2)  ;;  %v693_v15 = vld [vmem:[#allocation9 + $0x1a8] sm:$0xff] (!%p1875_p2)  ;;  %v691_v16 = vld [vmem:[#allocation9 + $0x198] sm:$0xff] (!%p1875_p2) }
  0xa5   : > { %v366_v54 = vadd.f32 %v365_v52, %v364_v53  ;;  %1890 = vmatprep.subr.bf16.mxu0 (!%p1875_p2), %v1889_v34  ;;  %2146 = vmatprep.subr.bf16.mxu1 (!%p1875_p2), %v2145_v38  ;;  %v670_v52 = vld [vmem:[#allocation9 + $0xf0] sm:$0xff] (!%p1875_p2)  ;;  %v673_v53 = vld [vmem:[#allocation9 + $0x108] sm:$0xff] (!%p1875_p2)  ;;  %v695_v17 = vld [vmem:[#allocation9 + $0x1b8] sm:$0xff] (!%p1875_p2)  ;;  %v1905_v20 = vpack.c.bf16 (!%p1875_p2), %v693_v15, %v689_v14 }
  0xa6   : > { %350 = vadd.xlane.f32.xlu0 %v349_v51  ;;  %v2149_v51 = vpack.c.bf16 (!%p1875_p2), %v671_v45, %v667_v44  ;;  %v692_v22 = vld [vmem:[#allocation9 + $0x1a0] sm:$0xff] (!%p1875_p2)  ;;  %v690_v23 = vld [vmem:[#allocation9 + $0x190] sm:$0xff] (!%p1875_p2)  ;;  %v2161_v24 = vpack.c.bf16 (!%p1875_p2), %v695_v17, %v691_v16  ;;  %v697_v26 = vld [vmem:[#allocation9 + $0x1c8] sm:$0xff] (!%p1875_p2) }
  0xa7   : > { %v694_v25 = vld [vmem:[#allocation9 + $0x1b0] sm:$0xff] (!%p1875_p2)  ;;  %v701_v27 = vld [vmem:[#allocation9 + $0x1e8] sm:$0xff] (!%p1875_p2)  ;;  %v699_v28 = vld [vmem:[#allocation9 + $0x1d8] sm:$0xff] (!%p1875_p2)  ;;  %v1907_v30 = vpack.c.bf16 (!%p1875_p2), %v692_v22, %v688_v21 }
  0xa8   : > { %1892 = vmatpush1.bf16.msra.mxu0 (!%p1875_p2), %v1891_v42  ;;  %2148 = vmatpush1.bf16.msra.mxu1 (!%p1875_p2), %v2147_v46  ;;  %v703_v29 = vld [vmem:[#allocation9 + $0x1f8] sm:$0xff] (!%p1875_p2)  ;;  %v2163_v31 = vpack.c.bf16 (!%p1875_p2), %v694_v25, %v690_v23  ;;  %v1909_v32 = vpack.c.bf16 (!%p1875_p2), %v701_v27, %v697_v26  ;;  %v700_v34 = vld [vmem:[#allocation9 + $0x1e0] sm:$0xff] (!%p1875_p2)  ;;  %v698_v35 = vld [vmem:[#allocation9 + $0x1d0] sm:$0xff] (!%p1875_p2) }
  0xa9   : > { %1894 = vmatprep.subr.bf16.mxu0 (!%p1875_p2), %v1893_v47  ;;  %2150 = vmatprep.subr.bf16.mxu1 (!%p1875_p2), %v2149_v51  ;;  %v2165_v36 = vpack.c.bf16 (!%p1875_p2), %v703_v29, %v699_v28  ;;  %v702_v37 = vld [vmem:[#allocation9 + $0x1f0] sm:$0xff] (!%p1875_p2)  ;;  %v705_v38 = vld [vmem:[#allocation9 + $0x208] sm:$0xff] (!%p1875_p2)  ;;  %v707_v40 = vld [vmem:[#allocation9 + $0x218] sm:$0xff] (!%p1875_p2) }
  0xaa   : > { %367 = vadd.xlane.f32.xlu0 %v366_v54  ;;  %v677_v54 = vld [vmem:[#allocation9 + $0x128] sm:$0xff] (!%p1875_p2)  ;;  %v711_v41 = vld [vmem:[#allocation9 + $0x238] sm:$0xff] (!%p1875_p2)  ;;  %v2167_v43 = vpack.c.bf16 (!%p1875_p2), %v702_v37, %v698_v35  ;;  %v704_v45 = vld [vmem:[#allocation9 + $0x200] sm:$0xff] (!%p1875_p2) }
  0xab   : > { %v709_v39 = vld [vmem:[#allocation9 + $0x228] sm:$0xff] (!%p1875_p2)  ;;  %v708_v46 = vld [vmem:[#allocation9 + $0x220] sm:$0xff] (!%p1875_p2)  ;;  %v706_v47 = vld [vmem:[#allocation9 + $0x210] sm:$0xff] (!%p1875_p2) }
  0xac   : > { %v1913_v44 = vpack.c.bf16 (!%p1875_p2), %v709_v39, %v705_v38  ;;  %v717_v51 = vld [vmem:[#allocation9 + $0x268] sm:$0xff] (!%p1875_p2)  ;;  %v726_v10 = vld [vmem:[#allocation9 + $0x2b0] sm:$0xff] (!%p1875_p2)  ;;  %v731_v13 = vld [vmem:[#allocation9 + $0x2d8] sm:$0xff] (!%p1875_p2) }
  0xad   : > { %v729_v11 = vld [vmem:[#allocation9 + $0x2c8] sm:$0xff] (!%p1875_p2)  ;;  %v735_v14 = vld [vmem:[#allocation9 + $0x2f8] sm:$0xff] (!%p1875_p2)  ;;  %v734_v22 = vld [vmem:[#allocation9 + $0x2f0] sm:$0xff] (!%p1875_p2) }
  0xae   : > { %v2181_v21 = vpack.c.bf16 (!%p1875_p2), %v735_v14, %v731_v13  ;;  %v737_v23 = vld [vmem:[#allocation9 + $0x308] sm:$0xff] (!%p1875_p2)  ;;  %v739_v25 = vld [vmem:[#allocation9 + $0x318] sm:$0xff] (!%p1875_p2) }
  0xaf   : > { %v743_v26 = vld [vmem:[#allocation9 + $0x338] sm:$0xff] (!%p1875_p2)  ;;  %v745_v35 = vld [vmem:[#allocation9 + $0x348] sm:$0xff] (!%p1875_p2) }
  0xb0   : > { %v747_v37 = vld [vmem:[#allocation9 + $0x358] sm:$0xff] (!%p1875_p2) }
  0xb1   : > { %v751_v38 = vld [vmem:[#allocation9 + $0x378] sm:$0xff] (!%p1875_p2) }
 0x133   : > { %v351_v58 = vpop.xlane.xlu0 %350 }
 0x134   : > { %v376_v61 = vrot.slane %v351_v58, %v375_v59  ;;  %v1895_v58 = vpack.c.bf16 (!%p1875_p2), %v668_v49, %v664_v48  ;;  %v2169_v48 = vpack.c.bf16 (!%p1875_p2), %v711_v41, %v707_v40  ;;  %v710_v49 = vld [vmem:[#allocation9 + $0x230] sm:$0xff] (!%p1875_p2) }
 0x136   : > { %1896 = vmatpush1.bf16.msra.mxu0 (!%p1875_p2), %v1895_v58  ;;  %v712_v58 = vld [vmem:[#allocation9 + $0x240] sm:$0xff] (!%p1875_p2) }
 0x137   : > { %v368_v60 = vpop.xlane.xlu0 %367  ;;  %390 = sbr.rel (%p1875_p2) target bundleno = 886 (0x376), region = 87 }
 0x138   : > { %v380_v63 = vrot.slane %v368_v60, %v375_v59  ;;  %v2151_v59 = vpack.c.bf16 (!%p1875_p2), %v670_v52, %v666_v50  ;;  %v1897_v60 = vpack.c.bf16 (!%p1875_p2), %v677_v54, %v673_v53  ;;  %v713_v50 = vld [vmem:[#allocation9 + $0x248] sm:$0xff] (!%p1875_p2)  ;;  %v715_v52 = vld [vmem:[#allocation9 + $0x258] sm:$0xff] (!%p1875_p2)  ;;  %v1915_v54 = vpack.c.bf16 (!%p1875_p2), %v708_v46, %v704_v45  ;;  %v750_v46 = vld [vmem:[#allocation9 + $0x370] sm:$0xff] (!%p1875_p2) }
 0x139   : > { %v719_v53 = vld [vmem:[#allocation9 + $0x278] sm:$0xff] (!%p1875_p2)  ;;  %v2189_v45 = vpack.c.bf16 (!%p1875_p2), %v751_v38, %v747_v37 }
 0x13a   : > { %v382_v0 = vsel %vm381_vm2, %v380_v63, %v376_v61  ;;  %v672_v61 = vld [vmem:[#allocation9 + $0x100] sm:$0xff] (!%p1875_p2)  ;;  %v674_v63 = vld [vmem:[#allocation9 + $0x110] sm:$0xff] (!%p1875_p2)  ;;  %2152 = vmatpush1.bf16.msra.mxu1 (!%p1875_p2), %v2151_v59  ;;  %1898 = vmatprep.subr.bf16.mxu0 (!%p1875_p2), %v1897_v60 }
 0x13b   : > { %v384_v1 = vadd.f32 %v382_v0, %v309_v62  ;;  %v676_v62 = vld [vmem:[#allocation9 + $0x120] sm:$0xff] (!%p1875_p2)  ;;  %v2153_v0 = vpack.c.bf16 (!%p1875_p2), %v679_v56, %v675_v55  ;;  %v2171_v55 = vpack.c.bf16 (!%p1875_p2), %v710_v49, %v706_v47  ;;  %v1917_v56 = vpack.c.bf16 (!%p1875_p2), %v717_v51, %v713_v50  ;;  %v714_v60 = vld [vmem:[#allocation9 + $0x250] sm:$0xff] (!%p1875_p2)  ;;  %v753_v47 = vld [vmem:[#allocation9 + $0x388] sm:$0xff] (!%p1875_p2) }
 0x13c   : > { %v1899_v7 = vpack.c.bf16 (!%p1875_p2), %v676_v62, %v672_v61  ;;  %v716_v59 = vld [vmem:[#allocation9 + $0x260] sm:$0xff] (!%p1875_p2)  ;;  %v2173_v61 = vpack.c.bf16 (!%p1875_p2), %v719_v53, %v715_v52  ;;  %v718_v62 = vld [vmem:[#allocation9 + $0x270] sm:$0xff] (!%p1875_p2)  ;;  %v755_v49 = vld [vmem:[#allocation9 + $0x398] sm:$0xff] (!%p1875_p2) }
 0x13d   : > { %386 = vst.msk [vmem:[#allocation2] sm:$0x3] %vm385_vm3, %v384_v1  ;;  %v678_v1 = vld [vmem:[#allocation9 + $0x130] sm:$0xff] (!%p1875_p2)  ;;  %2154 = vmatprep.subr.bf16.mxu1 (!%p1875_p2), %v2153_v0  ;;  %v725_v0 = vld [vmem:[#allocation9 + $0x2a8] sm:$0xff] (!%p1875_p2)  ;;  %v759_v50 = vld [vmem:[#allocation9 + $0x3b8] sm:$0xff] (!%p1875_p2) }
 0x13e   : > { %1900 = vmatpush1.bf16.msra.mxu0 %v1899_v7  ;;  %v720_v7 = vld [vmem:[#allocation9 + $0x280] sm:$0xff] }
 0x144   : > { %v391_v2 = vld [vmem:[#allocation2] sm:$0x3] }
 0x145   : > { %v392_v5 = vmul.f32 0.00048828125, %v391_v2  ;;  %v681_v2 = vld [vmem:[#allocation9 + $0x148] sm:$0xff] }
 0x146   : > { %v1901_v8 = vpack.c.bf16 %v685_v3, %v681_v2  ;;  %v727_v2 = vld [vmem:[#allocation9 + $0x2b8] sm:$0xff]  ;;  %v1919_v3 = vpack.c.bf16 %v716_v59, %v712_v58  ;;  %v2193_v58 = vpack.c.bf16 %v759_v50, %v755_v49  ;;  %v758_v59 = vld [vmem:[#allocation9 + $0x3b0] sm:$0xff] }
 0x147   : > { %396 = vperm.xlu0 %2488, %v392_v5   ;;  %522 = vperm.xlu1 %2490, %v392_v5  }
 0x148   : > { %1902 = vmatprep.subr.bf16.mxu0 %v1901_v8  ;;  %v722_v8 = vld [vmem:[#allocation9 + $0x290] sm:$0xff] }
 0x149   : > { %1904 = vmatpush1.bf16.msra.mxu0 %v1903_v18  ;;  %v2179_v16 = vpack.c.bf16 %v726_v10, %v722_v8  ;;  %v728_v18 = vld [vmem:[#allocation9 + $0x2c0] sm:$0xff]  ;;  %v769_v8 = vld [vmem:[#allocation9 + $0x408] sm:$0xff]  ;;  %v771_v10 = vld [vmem:[#allocation9 + $0x418] sm:$0xff] }
 0x14a   : > { %1906 = vmatprep.subr.bf16.mxu0 %v1905_v20  ;;  %v730_v20 = vld [vmem:[#allocation9 + $0x2d0] sm:$0xff] }
 0x14b   : > { %2489 = vset.pattern.permute.xlu0 %v2679_v33  ;;  %v696_v33 = vld [vmem:[#allocation9 + $0x1c0] sm:$0xff]  ;;  %v2183_v28 = vpack.c.bf16 %v734_v22, %v730_v20  ;;  %v2916_v22 = vsub.s32 2, %v2895_v57 }
 0x14c   : > { %459 = vperm.xlu0 %2489, %v392_v5   ;;  %v687_v5 = vld [vmem:[#allocation9 + $0x178] sm:$0xff]  ;;  %v1911_v42 = vpack.c.bf16 %v700_v34, %v696_v33  ;;  %v2185_v33 = vpack.c.bf16 %v743_v26, %v739_v25  ;;  %v742_v34 = vld [vmem:[#allocation9 + $0x330] sm:$0xff]  ;;  %v2927_v26 = vsub.s32 4, %v2895_v57 }
 0x14d   : > { %v2157_v12 = vpack.c.bf16 %v687_v5, %v683_v4  ;;  %1908 = vmatpush1.bf16.msra.mxu0 %v1907_v30  ;;  %v2175_v4 = vpack.c.bf16 %v718_v62, %v714_v60  ;;  %v736_v30 = vld [vmem:[#allocation9 + $0x300] sm:$0xff]  ;;  %v761_v60 = vld [vmem:[#allocation9 + $0x3c8] sm:$0xff]  ;;  %v763_v62 = vld [vmem:[#allocation9 + $0x3d8] sm:$0xff] }
 0x14e   : > { %1910 = vmatprep.subr.bf16.mxu0 %v1909_v32  ;;  %v738_v32 = vld [vmem:[#allocation9 + $0x310] sm:$0xff] }
 0x14f   : > { %v2187_v40 = vpack.c.bf16 %v742_v34, %v738_v32  ;;  %v2911_v20 = vld [vmem:[#allocation4 + $0x2] ss:$4 sm:$0xff] }
 0x150   : > { %2491 = vset.pattern.permute.xlu0 %v2678_v6  ;;  %v2155_v6 = vpack.c.bf16 %v678_v1, %v674_v63  ;;  %v721_v63 = vld [vmem:[#allocation9 + $0x288] sm:$0xff]  ;;  %v723_v1 = vld [vmem:[#allocation9 + $0x298] sm:$0xff] }
 0x151   : > { %1912 = vmatpush1.bf16.msra.mxu0 %v1911_v42  ;;  %v1921_v5 = vpack.c.bf16 %v725_v0, %v721_v63  ;;  %v2177_v9 = vpack.c.bf16 %v727_v2, %v723_v1  ;;  %v744_v42 = vld [vmem:[#allocation9 + $0x340] sm:$0xff]  ;;  %v767_v63 = vld [vmem:[#allocation9 + $0x3f8] sm:$0xff] }
 0x152   : > { %2156 = vmatpush1.bf16.msra.mxu1 %v2155_v6  ;;  %1914 = vmatprep.subr.bf16.mxu0 %v1913_v44  ;;  %v724_v6 = vld [vmem:[#allocation9 + $0x2a0] sm:$0xff]  ;;  %v746_v44 = vld [vmem:[#allocation9 + $0x350] sm:$0xff] }
 0x153   : > { %2158 = vmatprep.subr.bf16.mxu1 %v2157_v12  ;;  %v733_v12 = vld [vmem:[#allocation9 + $0x2e8] sm:$0xff]  ;;  %v1923_v15 = vpack.c.bf16 %v724_v6, %v720_v7  ;;  %v2191_v52 = vpack.c.bf16 %v750_v46, %v746_v44  ;;  %v2197_v7 = vpack.c.bf16 %v767_v63, %v763_v62  ;;  %v766_v6 = vld [vmem:[#allocation9 + $0x3f0] sm:$0xff]  ;;  %v545_v46 = vrot.slane %v2911_v20, %v2927_v26 }
 0x154   : > { %v1925_v17 = vpack.c.bf16 %v733_v12, %v729_v11  ;;  %v775_v11 = vld [vmem:[#allocation9 + $0x438] sm:$0xff] }
 0x155   : > { %1916 = vmatpush1.bf16.msra.mxu0 %v1915_v54  ;;  %v752_v54 = vld [vmem:[#allocation9 + $0x380] sm:$0xff] }
 0x156   : > { %2160 = vmatpush1.bf16.msra.mxu1 %v2159_v19  ;;  %1918 = vmatprep.subr.bf16.mxu0 %v1917_v56  ;;  %v732_v19 = vld [vmem:[#allocation9 + $0x2e0] sm:$0xff]  ;;  %v754_v56 = vld [vmem:[#allocation9 + $0x390] sm:$0xff] }
 0x157   : > { %2162 = vmatprep.subr.bf16.mxu1 %v2161_v24  ;;  %v741_v24 = vld [vmem:[#allocation9 + $0x328] sm:$0xff]  ;;  %v1927_v27 = vpack.c.bf16 %v732_v19, %v728_v18  ;;  %v2195_v1 = vpack.c.bf16 %v758_v59, %v754_v56  ;;  %v2907_v18 = vsub.s32 0, %v2895_v57 }
 0x158   : > { %v1929_v29 = vpack.c.bf16 %v741_v24, %v737_v23  ;;  %v2909_v19 = vld [vmem:[#allocation4 + $0x1] ss:$4 sm:$0xff]  ;;  %v2919_v23 = vsub.s32 3, %v2895_v57  ;;  %v2922_v24 = vsub.s32 5, %v2895_v57 }
 0x159   : > { %1920 = vmatpush1.bf16.msra.mxu0 %v1919_v3  ;;  %v760_v3 = vld [vmem:[#allocation9 + $0x3c0] sm:$0xff]  ;;  %v529_v34 = vrot.slane %v2911_v20, %v2907_v18 }
 0x15a   : > { %2164 = vmatpush1.bf16.msra.mxu1 %v2163_v31  ;;  %1922 = vmatprep.subr.bf16.mxu0 %v1921_v5  ;;  %v740_v31 = vld [vmem:[#allocation9 + $0x320] sm:$0xff]  ;;  %v762_v5 = vld [vmem:[#allocation9 + $0x3d0] sm:$0xff]  ;;  %v541_v44 = vrot.slane %v2911_v20, %v2919_v23 }
 0x15b   : > { %2166 = vmatprep.subr.bf16.mxu1 %v2165_v36  ;;  %v749_v36 = vld [vmem:[#allocation9 + $0x368] sm:$0xff]  ;;  %v1931_v39 = vpack.c.bf16 %v740_v31, %v736_v30  ;;  %v2199_v13 = vpack.c.bf16 %v766_v6, %v762_v5 }
 0x15c   : > { %v1933_v41 = vpack.c.bf16 %v749_v36, %v745_v35  ;;  %v537_v36 = vrot.slane %v2911_v20, %v2916_v22 }
 0x15d   : > { %1924 = vmatpush1.bf16.msra.mxu0 %v1923_v15  ;;  %v2201_v15 = vpack.c.bf16 %v775_v11, %v771_v10 }
 0x15e   : > { %2168 = vmatpush1.bf16.msra.mxu1 %v2167_v43  ;;  %1926 = vmatprep.subr.bf16.mxu0 %v1925_v17  ;;  %v748_v43 = vld [vmem:[#allocation9 + $0x360] sm:$0xff] }
 0x15f   : > { %2170 = vmatprep.subr.bf16.mxu1 %v2169_v48  ;;  %v757_v48 = vld [vmem:[#allocation9 + $0x3a8] sm:$0xff]  ;;  %v1935_v51 = vpack.c.bf16 %v748_v43, %v744_v42  ;;  %v478_v43 = vrot.slane %v2909_v19, %v2919_v23 }
 0x160   : > { %v1937_v53 = vpack.c.bf16 %v757_v48, %v753_v47  ;;  %v2904_v17 = vld [vmem:[#allocation4] ss:$4 sm:$0xff]  ;;  %v474_v47 = vrot.slane %v2909_v19, %v2916_v22  ;;  %v486_v48 = vrot.slane %v2909_v19, %v2922_v24 }
 0x161   : > { %1928 = vmatpush1.bf16.msra.mxu0 %v1927_v27  ;;  %v2930_v27 = vsub.s32 7, %v2895_v57  ;;  %v403_v32 = vrot.slane %v2904_v17, %v2907_v18  ;;  %v411_v35 = vrot.slane %v2904_v17, %v2916_v22  ;;  %v415_v38 = vrot.slane %v2904_v17, %v2919_v23 }
 0x162   : > { %2172 = vmatpush1.bf16.msra.mxu1 %v2171_v55  ;;  %1930 = vmatprep.subr.bf16.mxu0 %v1929_v29  ;;  %v756_v55 = vld [vmem:[#allocation9 + $0x3a0] sm:$0xff] }
 0x163   : > { %2174 = vmatprep.subr.bf16.mxu1 %v2173_v61  ;;  %v765_v61 = vld [vmem:[#allocation9 + $0x3e8] sm:$0xff]  ;;  %v1939_v0 = vpack.c.bf16 %v756_v55, %v752_v54  ;;  %v431_v49 = vrot.slane %v2904_v17, %v2930_v27  ;;  %v557_v50 = vrot.slane %v2911_v20, %v2930_v27  ;;  %v494_v54 = vrot.slane %v2909_v19, %v2930_v27 }
 0x164   : > { %v1941_v2 = vpack.c.bf16 %v765_v61, %v761_v60 }
 0x165   : > { %1932 = vmatpush1.bf16.msra.mxu0 %v1931_v39  ;;  %v423_v39 = vrot.slane %v2904_v17, %v2922_v24 }
 0x166   : > { %2176 = vmatpush1.bf16.msra.mxu1 %v2175_v4  ;;  %1934 = vmatprep.subr.bf16.mxu0 %v1933_v41  ;;  %v764_v4 = vld [vmem:[#allocation9 + $0x3e0] sm:$0xff] }
 0x167   : > { %2178 = vmatprep.subr.bf16.mxu1 %v2177_v9  ;;  %v773_v9 = vld [vmem:[#allocation9 + $0x428] sm:$0xff]  ;;  %v1943_v12 = vpack.c.bf16 %v764_v4, %v760_v3 }
 0x168   : > { %v1945_v14 = vpack.c.bf16 %v773_v9, %v769_v8 }
 0x169   : > { %1936 = vmatpush1.bf16.msra.mxu0 %v1935_v51 }
 0x16a   : > { %2180 = vmatpush1.bf16.msra.mxu1 %v2179_v16  ;;  %1938 = vmatprep.subr.bf16.mxu0 %v1937_v53  ;;  %v2902_v16 = vsub.s32 1, %v2895_v57  ;;  %v482_v53 = vrot.slane %v2909_v19, %v2927_v26 }
 0x16b   : > { %2182 = vmatprep.subr.bf16.mxu1 %v2181_v21  ;;  %v2913_v21 = vld [vmem:[#allocation7] sm:$0xff] }
 0x16c   : > { %v407_v25 = vrot.slane %v2904_v17, %v2902_v16  ;;  %v470_v29 = vrot.slane %v2909_v19, %v2902_v16  ;;  %v533_v30 = vrot.slane %v2911_v20, %v2902_v16  ;;  %v591_v31 = vrot.slane %v2913_v21, %v2902_v16 }
 0x16d   : > { %1940 = vmatpush1.bf16.msra.mxu0 %v1939_v0  ;;  %v587_v37 = vrot.slane %v2913_v21, %v2907_v18  ;;  %v595_v9 = vrot.slane %v2913_v21, %v2916_v22 }
 0x16e   : > { %2184 = vmatpush1.bf16.msra.mxu1 %v2183_v28  ;;  %1942 = vmatprep.subr.bf16.mxu0 %v1941_v2  ;;  %v2933_v28 = vsub.s32 6, %v2895_v57 }
 0x16f   : > { %2186 = vmatprep.subr.bf16.mxu1 %v2185_v33  ;;  %v466_v33 = vrot.slane %v2909_v19, %v2907_v18 }
 0x171   : > { %1944 = vmatpush1.bf16.msra.mxu0 %v1943_v12 }
 0x172   : > { %2188 = vmatpush1.bf16.msra.mxu1 %v2187_v40  ;;  %1946 = vmatprep.subr.bf16.mxu0 %v1945_v14  ;;  %v549_v40 = vrot.slane %v2911_v20, %v2922_v24 }
 0x173   : > { %2190 = vmatprep.subr.bf16.mxu1 %v2189_v45  ;;  %v419_v45 = vrot.slane %v2904_v17, %v2927_v26 }
 0x176   : > { %2192 = vmatpush1.bf16.msra.mxu1 %v2191_v52 }
 0x177   : > { %2194 = vmatprep.subr.bf16.mxu1 %v2193_v58 }
 0x17a   : > { %2196 = vmatpush1.bf16.msra.mxu1 %v2195_v1 }
 0x17b   : > { %2198 = vmatprep.subr.bf16.mxu1 %v2197_v7 }
 0x17e   : > { %2200 = vmatpush1.bf16.msra.mxu1 %v2199_v13 }
 0x17f   : > { %2202 = vmatprep.subr.bf16.mxu1 %v2201_v15 }
 0x1c6   : > { %v2959_v41 = vpop.permute.xlu0 %396  ;;  %v2961_v42 = vpop.permute.xlu1 %522 }
 0x1c7   : > { %v442_v51 = vmul.f32 %v411_v35, %v2959_v41  ;;  %v568_v52 = vmul.f32 %v537_v36, %v2961_v42  ;;  %v441_v55 = vmul.f32 %v407_v25, %v2959_v41  ;;  %v567_v56 = vmul.f32 %v533_v30, %v2961_v42  ;;  %v768_v36 = vld [vmem:[#allocation9 + $0x400] sm:$0xff] }
 0x1c8   : > { %v445_v58 = vmul.f32 %v423_v39, %v2959_v41  ;;  %v571_v59 = vmul.f32 %v549_v40, %v2961_v42  ;;  %v440_v60 = vmul.f32 %v403_v32, %v2959_v41  ;;  %v566_v61 = vmul.f32 %v529_v34, %v2961_v42 }
 0x1c9   : > { %v444_v62 = vmul.f32 %v419_v45, %v2959_v41  ;;  %v570_v63 = vmul.f32 %v545_v46, %v2961_v42  ;;  %v443_v1 = vmul.f32 %v415_v38, %v2959_v41  ;;  %v569_v2 = vmul.f32 %v541_v44, %v2961_v42  ;;  %v772_v38 = vld [vmem:[#allocation9 + $0x420] sm:$0xff]  ;;  %v774_v44 = vld [vmem:[#allocation9 + $0x430] sm:$0xff]  ;;  %v777_v45 = vld [vmem:[#allocation9 + $0x448] sm:$0xff] }
 0x1ca   : > { %v447_v3 = vmul.f32 %v431_v49, %v2959_v41  ;;  %v573_v4 = vmul.f32 %v557_v50, %v2961_v42  ;;  %v607_v32 = vrot.slane %v2913_v21, %v2922_v24  ;;  %v490_v49 = vrot.slane %v2909_v19, %v2933_v28  ;;  %v781_v50 = vld [vmem:[#allocation9 + $0x468] sm:$0xff] }
 0x1cb   : > { %v2993_v0 = vpop.permute.xlu0 %459  ;;  %v615_v19 = vrot.slane %v2913_v21, %v2930_v27 }
 0x1cc   : > { %v504_v5 = vmul.f32 %v470_v29, %v2993_v0  ;;  %v503_v7 = vmul.f32 %v466_v33, %v2993_v0  ;;  %v506_v6 = vmul.f32 %v478_v43, %v2993_v0  ;;  %v505_v8 = vmul.f32 %v474_v47, %v2993_v0  ;;  %v770_v43 = vld [vmem:[#allocation9 + $0x410] sm:$0xff] }
 0x1cd   : > { %v508_v10 = vmul.f32 %v486_v48, %v2993_v0  ;;  %v507_v11 = vmul.f32 %v482_v53, %v2993_v0  ;;  %v510_v12 = vmul.f32 %v494_v54, %v2993_v0  ;;  %v599_v29 = vrot.slane %v2913_v21, %v2919_v23  ;;  %v783_v53 = vld [vmem:[#allocation9 + $0x478] sm:$0xff] }
 0x1ce   : > { %v512_v13 = vadd.f32 %v504_v5, %v441_v55  ;;  %v511_v14 = vadd.f32 %v503_v7, %v440_v60  ;;  %v514_v15 = vadd.f32 %v506_v6, %v443_v1  ;;  %v513_v25 = vadd.f32 %v505_v8, %v442_v51  ;;  %v779_v51 = vld [vmem:[#allocation9 + $0x458] sm:$0xff]  ;;  %v782_v5 = vld [vmem:[#allocation9 + $0x470] sm:$0xff]  ;;  %v789_v8 = vld [vmem:[#allocation9 + $0x4a8] sm:$0xff] }
 0x1cf   : > { %v516_v30 = vadd.f32 %v508_v10, %v445_v58  ;;  %v427_v33 = vrot.slane %v2904_v17, %v2933_v28  ;;  %v515_v47 = vadd.f32 %v507_v11, %v444_v62  ;;  %v518_v48 = vadd.f32 %v510_v12, %v447_v3  ;;  %v780_v62 = vld [vmem:[#allocation9 + $0x460] sm:$0xff]  ;;  %v778_v3 = vld [vmem:[#allocation9 + $0x450] sm:$0xff] }
 0x1d0   : > { %v575_v34 = vadd.f32 %v567_v56, %v512_v13  ;;  %v574_v35 = vadd.f32 %v566_v61, %v511_v14  ;;  %v577_v39 = vadd.f32 %v569_v2, %v514_v15  ;;  %v576_v40 = vadd.f32 %v568_v52, %v513_v25  ;;  %v776_v61 = vld [vmem:[#allocation9 + $0x440] sm:$0xff] }
 0x1d1   : > { %v579_v46 = vadd.f32 %v571_v59, %v516_v30  ;;  %v553_v52 = vrot.slane %v2911_v20, %v2933_v28  ;;  %v603_v58 = vrot.slane %v2913_v21, %v2927_v26  ;;  %v2203_v60 = vpack.c.bf16 %v774_v44, %v770_v43  ;;  %v785_v20 = vld [vmem:[#allocation9 + $0x488] sm:$0xff]  ;;  %v787_v26 = vld [vmem:[#allocation9 + $0x498] sm:$0xff]  ;;  %v788_v25 = vld [vmem:[#allocation9 + $0x4a0] sm:$0xff] }
 0x1d2   : > { %v625_v24 = vadd.f32 %v591_v31, %v575_v34  ;;  %v624_v17 = vadd.f32 %v587_v37, %v574_v35  ;;  %v3019_v54 = vadd.f32 %v595_v9, %v576_v40  ;;  %v627_v55 = vadd.f32 %v599_v29, %v577_v39  ;;  %v791_v9 = vld [vmem:[#allocation9 + $0x4b8] sm:$0xff]  ;;  %v786_v30 = vld [vmem:[#allocation9 + $0x490] sm:$0xff]  ;;  %v797_v34 = vld [vmem:[#allocation9 + $0x4e8] sm:$0xff] }
 0x1d3   : > { %v3023_v56 = vadd.f32 %v607_v32, %v579_v46  ;;  %v1947_v37 = vpack.c.bf16 %v772_v38, %v768_v36  ;;  %v1949_v1 = vpack.c.bf16 %v781_v50, %v777_v45  ;;  %v2205_v2 = vpack.c.bf16 %v783_v53, %v779_v51  ;;  %v790_v32 = vld [vmem:[#allocation9 + $0x4b0] sm:$0xff]  ;;  %v795_v35 = vld [vmem:[#allocation9 + $0x4d8] sm:$0xff]  ;;  %v792_v43 = vld [vmem:[#allocation9 + $0x4c0] sm:$0xff] }
 0x1d4   : > { %v633_v59 = vmax.f32 %v625_v24, 0.0  ;;  %v632_v31 = vmax.f32 %v624_v17, 0.0  ;;  %v578_v7 = vadd.f32 %v570_v63, %v515_v47  ;;  %v581_v6 = vadd.f32 %v573_v4, %v518_v48  ;;  %v784_v4 = vld [vmem:[#allocation9 + $0x480] sm:$0xff]  ;;  %v799_v36 = vld [vmem:[#allocation9 + $0x4f8] sm:$0xff]  ;;  %v794_v46 = vld [vmem:[#allocation9 + $0x4d0] sm:$0xff] }
 0x1d5   : > { %v446_v27 = vmul.f32 %v427_v33, %v2959_v41  ;;  %v509_v10 = vmul.f32 %v490_v49, %v2993_v0  ;;  %v572_v11 = vmul.f32 %v553_v52, %v2961_v42  ;;  %v635_v12 = vmax.f32 %v627_v55, 0.0  ;;  %v793_v33 = vld [vmem:[#allocation9 + $0x4c8] sm:$0xff]  ;;  %v796_v44 = vld [vmem:[#allocation9 + $0x4e0] sm:$0xff]  ;;  %v798_v47 = vld [vmem:[#allocation9 + $0x4f0] sm:$0xff] }
 0x1d6   : > { %1238 = vmatprep.mubr.f32.mxu0 %v633_v59  ;;  %1522 = vmatprep.mubr.f32.mxu1 %v633_v59  ;;  %v1951_v13 = vpack.c.bf16 %v780_v62, %v776_v61  ;;  %v3032_v14 = vadd.f32 %v603_v58, %v578_v7  ;;  %v3034_v15 = vadd.f32 %v615_v19, %v581_v6  ;;  %v801_v48 = vld [vmem:[#allocation9 + $0x508] sm:$0xff]  ;;  %v803_v24 = vld [vmem:[#allocation9 + $0x518] sm:$0xff]  ;;  %v800_v53 = vld [vmem:[#allocation9 + $0x500] sm:$0xff] }
 0x1d7   : > { %1239 = vmatmul.mubr.f32.vlgmr.msra.gmra.mrb[0].mxu0 %v632_v31  ;;  %1523 = vmatmul.mubr.f32.vlgmr.msra.gmra.mrb[0].mxu1 %v632_v31  ;;  %v2207_v63 = vpack.c.bf16 %v782_v5, %v778_v3  ;;  %v517_v29 = vadd.f32 %v509_v10, %v446_v27  ;;  %v611_v41 = vrot.slane %v2913_v21, %v2933_v28  ;;  %v805_v49 = vld [vmem:[#allocation9 + $0x528] sm:$0xff]  ;;  %v807_v17 = vld [vmem:[#allocation9 + $0x538] sm:$0xff]  ;;  %v804_v52 = vld [vmem:[#allocation9 + $0x520] sm:$0xff] }
 0x1d8   : > { %1948 = vmatpush1.bf16.msra.mxu0 %v1947_v37  ;;  %2204 = vmatpush1.bf16.msra.mxu1 %v2203_v60  ;;  %v1953_v42 = vpack.c.bf16 %v789_v8, %v785_v20  ;;  %v2209_v0 = vpack.c.bf16 %v791_v9, %v787_v26  ;;  %v1955_v39 = vpack.c.bf16 %v788_v25, %v784_v4  ;;  %v802_v19 = vld [vmem:[#allocation9 + $0x510] sm:$0xff]  ;;  %v809_v31 = vld [vmem:[#allocation9 + $0x548] sm:$0xff]  ;;  %v811_v60 = vld [vmem:[#allocation9 + $0x558] sm:$0xff] }
 0x1d9   : > { %1309 = vmatprep.mubr.f32.mxu0 %v635_v12  ;;  %1593 = vmatprep.mubr.f32.mxu1 %v635_v12  ;;  %v580_v38 = vadd.f32 %v572_v11, %v517_v29  ;;  %v2211_v40 = vpack.c.bf16 %v790_v32, %v786_v30  ;;  %v1957_v28 = vpack.c.bf16 %v797_v34, %v793_v33  ;;  %v806_v59 = vld [vmem:[#allocation9 + $0x530] sm:$0xff]  ;;  %v813_v37 = vld [vmem:[#allocation9 + $0x568] sm:$0xff]  ;;  %v815_v61 = vld [vmem:[#allocation9 + $0x578] sm:$0xff] }
 0x1da   : > { %1950 = vmatprep.subr.bf16.mxu0 %v1949_v1  ;;  %2206 = vmatprep.subr.bf16.mxu1 %v2205_v2  ;;  %v2213_v45 = vpack.c.bf16 %v799_v36, %v795_v35  ;;  %v1959_v50 = vpack.c.bf16 %v796_v44, %v792_v43  ;;  %v2215_v51 = vpack.c.bf16 %v798_v47, %v794_v46  ;;  %v808_v2 = vld [vmem:[#allocation9 + $0x540] sm:$0xff]  ;;  %v810_v7 = vld [vmem:[#allocation9 + $0x550] sm:$0xff]  ;;  %v817_v8 = vld [vmem:[#allocation9 + $0x588] sm:$0xff] }
 0x1db   : > { %v3038_v21 = vadd.f32 %v611_v41, %v580_v38  ;;  %v1961_v55 = vpack.c.bf16 %v805_v49, %v801_v48  ;;  %v2217_v58 = vpack.c.bf16 %v807_v17, %v803_v24  ;;  %v1963_v62 = vpack.c.bf16 %v804_v52, %v800_v53  ;;  %v812_v3 = vld [vmem:[#allocation9 + $0x560] sm:$0xff]  ;;  %v814_v6 = vld [vmem:[#allocation9 + $0x570] sm:$0xff]  ;;  %v821_v26 = vld [vmem:[#allocation9 + $0x5a8] sm:$0xff] }
 0x1dc   : > { %1952 = vmatpush1.bf16.msra.mxu0 %v1951_v13  ;;  %2208 = vmatpush1.bf16.msra.mxu1 %v2207_v63  ;;  %v2219_v1 = vpack.c.bf16 %v806_v59, %v802_v19  ;;  %v1965_v5 = vpack.c.bf16 %v813_v37, %v809_v31  ;;  %v2221_v20 = vpack.c.bf16 %v815_v61, %v811_v60  ;;  %v819_v9 = vld [vmem:[#allocation9 + $0x598] sm:$0xff]  ;;  %v816_v12 = vld [vmem:[#allocation9 + $0x580] sm:$0xff]  ;;  %v818_v25 = vld [vmem:[#allocation9 + $0x590] sm:$0xff] }
 0x1dd   : > { %1954 = vmatprep.subr.bf16.mxu0 %v1953_v42  ;;  %2210 = vmatprep.subr.bf16.mxu1 %v2209_v0  ;;  %v823_v27 = vld [vmem:[#allocation9 + $0x5b8] sm:$0xff]  ;;  %v1967_v10 = vpack.c.bf16 %v812_v3, %v808_v2  ;;  %v2223_v11 = vpack.c.bf16 %v814_v6, %v810_v7  ;;  %v820_v13 = vld [vmem:[#allocation9 + $0x5a0] sm:$0xff]  ;;  %v1969_v63 = vpack.c.bf16 %v821_v26, %v817_v8  ;;  %v822_v29 = vld [vmem:[#allocation9 + $0x5b0] sm:$0xff] }
 0x1de   : > { %v2225_v4 = vpack.c.bf16 %v823_v27, %v819_v9  ;;  %v825_v41 = vld [vmem:[#allocation9 + $0x5c8] sm:$0xff]  ;;  %v827_v0 = vld [vmem:[#allocation9 + $0x5d8] sm:$0xff]  ;;  %v1971_v32 = vpack.c.bf16 %v820_v13, %v816_v12  ;;  %v2227_v33 = vpack.c.bf16 %v822_v29, %v818_v25  ;;  %v824_v34 = vld [vmem:[#allocation9 + $0x5c0] sm:$0xff] }
 0x1df   : > { %v829_v42 = vld [vmem:[#allocation9 + $0x5e8] sm:$0xff]  ;;  %v831_v30 = vld [vmem:[#allocation9 + $0x5f8] sm:$0xff]  ;;  %v828_v35 = vld [vmem:[#allocation9 + $0x5e0] sm:$0xff] }
 0x1e0   : > { %1956 = vmatpush1.bf16.msra.mxu0 %v1955_v39  ;;  %2212 = vmatpush1.bf16.msra.mxu1 %v2211_v40  ;;  %v1973_v36 = vpack.c.bf16 %v829_v42, %v825_v41  ;;  %v2229_v38 = vpack.c.bf16 %v831_v30, %v827_v0  ;;  %v826_v39 = vld [vmem:[#allocation9 + $0x5d0] sm:$0xff]  ;;  %v833_v43 = vld [vmem:[#allocation9 + $0x608] sm:$0xff]  ;;  %v1975_v46 = vpack.c.bf16 %v828_v35, %v824_v34  ;;  %v832_v48 = vld [vmem:[#allocation9 + $0x600] sm:$0xff] }
 0x1e1   : > { %1958 = vmatprep.subr.bf16.mxu0 %v1957_v28  ;;  %2214 = vmatprep.subr.bf16.mxu1 %v2213_v45  ;;  %v830_v40 = vld [vmem:[#allocation9 + $0x5f0] sm:$0xff]  ;;  %v837_v44 = vld [vmem:[#allocation9 + $0x628] sm:$0xff]  ;;  %v835_v28 = vld [vmem:[#allocation9 + $0x618] sm:$0xff] }
 0x1e2   : > { %v839_v45 = vld [vmem:[#allocation9 + $0x638] sm:$0xff]  ;;  %v2231_v47 = vpack.c.bf16 %v830_v40, %v826_v39  ;;  %v836_v49 = vld [vmem:[#allocation9 + $0x620] sm:$0xff]  ;;  %v1977_v24 = vpack.c.bf16 %v837_v44, %v833_v43  ;;  %v841_v53 = vld [vmem:[#allocation9 + $0x648] sm:$0xff] }
 0x1e3   : > { %v2233_v17 = vpack.c.bf16 %v839_v45, %v835_v28  ;;  %v845_v52 = vld [vmem:[#allocation9 + $0x668] sm:$0xff]  ;;  %v1979_v19 = vpack.c.bf16 %v836_v49, %v832_v48  ;;  %v840_v31 = vld [vmem:[#allocation9 + $0x640] sm:$0xff] }
 0x1e4   : > { %1960 = vmatpush1.bf16.msra.mxu0 %v1959_v50  ;;  %2216 = vmatpush1.bf16.msra.mxu1 %v2215_v51  ;;  %v834_v50 = vld [vmem:[#allocation9 + $0x610] sm:$0xff]  ;;  %v844_v37 = vld [vmem:[#allocation9 + $0x660] sm:$0xff]  ;;  %v1981_v60 = vpack.c.bf16 %v845_v52, %v841_v53  ;;  %v849_v2 = vld [vmem:[#allocation9 + $0x688] sm:$0xff] }
 0x1e5   : > { %1962 = vmatprep.subr.bf16.mxu0 %v1961_v55  ;;  %2218 = vmatprep.subr.bf16.mxu1 %v2217_v58  ;;  %v838_v51 = vld [vmem:[#allocation9 + $0x630] sm:$0xff]  ;;  %v843_v55 = vld [vmem:[#allocation9 + $0x658] sm:$0xff]  ;;  %v853_v3 = vld [vmem:[#allocation9 + $0x6a8] sm:$0xff]  ;;  %v1983_v7 = vpack.c.bf16 %v844_v37, %v840_v31 }
 0x1e6   : > { %v847_v58 = vld [vmem:[#allocation9 + $0x678] sm:$0xff]  ;;  %v2235_v59 = vpack.c.bf16 %v838_v51, %v834_v50  ;;  %v848_v8 = vld [vmem:[#allocation9 + $0x680] sm:$0xff]  ;;  %v1985_v9 = vpack.c.bf16 %v853_v3, %v849_v2  ;;  %v857_v12 = vld [vmem:[#allocation9 + $0x6c8] sm:$0xff] }
 0x1e7   : > { %v2237_v61 = vpack.c.bf16 %v847_v58, %v843_v55  ;;  %v852_v26 = vld [vmem:[#allocation9 + $0x6a0] sm:$0xff]  ;;  %v861_v13 = vld [vmem:[#allocation9 + $0x6e8] sm:$0xff] }
 0x1e8   : > { %1964 = vmatpush1.bf16.msra.mxu0 %v1963_v62  ;;  %2220 = vmatpush1.bf16.msra.mxu1 %v2219_v1  ;;  %v842_v62 = vld [vmem:[#allocation9 + $0x650] sm:$0xff]  ;;  %v1987_v25 = vpack.c.bf16 %v852_v26, %v848_v8  ;;  %v856_v41 = vld [vmem:[#allocation9 + $0x6c0] sm:$0xff]  ;;  %v1989_v0 = vpack.c.bf16 %v861_v13, %v857_v12  ;;  %v865_v34 = vld [vmem:[#allocation9 + $0x708] sm:$0xff] }
 0x1e9   : > { %1966 = vmatprep.subr.bf16.mxu0 %v1965_v5  ;;  %2222 = vmatprep.subr.bf16.mxu1 %v2221_v20  ;;  %v846_v1 = vld [vmem:[#allocation9 + $0x670] sm:$0xff]  ;;  %v851_v5 = vld [vmem:[#allocation9 + $0x698] sm:$0xff]  ;;  %v860_v42 = vld [vmem:[#allocation9 + $0x6e0] sm:$0xff] }
 0x1ea   : > { %v855_v20 = vld [vmem:[#allocation9 + $0x6b8] sm:$0xff]  ;;  %v2239_v6 = vpack.c.bf16 %v846_v1, %v842_v62  ;;  %v869_v35 = vld [vmem:[#allocation9 + $0x728] sm:$0xff]  ;;  %v1991_v39 = vpack.c.bf16 %v860_v42, %v856_v41  ;;  %v864_v43 = vld [vmem:[#allocation9 + $0x700] sm:$0xff] }
 0x1eb   : > { %v2241_v27 = vpack.c.bf16 %v855_v20, %v851_v5  ;;  %v868_v44 = vld [vmem:[#allocation9 + $0x720] sm:$0xff]  ;;  %v1993_v28 = vpack.c.bf16 %v869_v35, %v865_v34  ;;  %v873_v48 = vld [vmem:[#allocation9 + $0x748] sm:$0xff] }
 0x1ec   : > { %1968 = vmatpush1.bf16.msra.mxu0 %v1967_v10  ;;  %2224 = vmatpush1.bf16.msra.mxu1 %v2223_v11  ;;  %v850_v10 = vld [vmem:[#allocation9 + $0x690] sm:$0xff]  ;;  %v877_v49 = vld [vmem:[#allocation9 + $0x768] sm:$0xff]  ;;  %v1995_v50 = vpack.c.bf16 %v868_v44, %v864_v43  ;;  %v872_v53 = vld [vmem:[#allocation9 + $0x740] sm:$0xff] }
 0x1ed   : > { %1970 = vmatprep.subr.bf16.mxu0 %v1969_v63  ;;  %2226 = vmatprep.subr.bf16.mxu1 %v2225_v4  ;;  %v854_v11 = vld [vmem:[#allocation9 + $0x6b0] sm:$0xff]  ;;  %v859_v63 = vld [vmem:[#allocation9 + $0x6d8] sm:$0xff]  ;;  %v876_v52 = vld [vmem:[#allocation9 + $0x760] sm:$0xff]  ;;  %v1997_v55 = vpack.c.bf16 %v877_v49, %v873_v48 }
 0x1ee   : > { %v863_v4 = vld [vmem:[#allocation9 + $0x6f8] sm:$0xff]  ;;  %v2243_v29 = vpack.c.bf16 %v854_v11, %v850_v10  ;;  %v881_v31 = vld [vmem:[#allocation9 + $0x788] sm:$0xff]  ;;  %v1999_v62 = vpack.c.bf16 %v876_v52, %v872_v53  ;;  %v880_v2 = vld [vmem:[#allocation9 + $0x780] sm:$0xff] }
 0x1ef   : > { %v2245_v30 = vpack.c.bf16 %v863_v4, %v859_v63  ;;  %v885_v37 = vld [vmem:[#allocation9 + $0x7a8] sm:$0xff]  ;;  %v884_v3 = vld [vmem:[#allocation9 + $0x7a0] sm:$0xff]  ;;  %v910_v52 = vld [vmem:[#allocation9 + $0x870] sm:$0xff] }
 0x1f0   : > { %1972 = vmatpush1.bf16.msra.mxu0 %v1971_v32  ;;  %2228 = vmatpush1.bf16.msra.mxu1 %v2227_v33  ;;  %v858_v32 = vld [vmem:[#allocation9 + $0x6d0] sm:$0xff]  ;;  %v2001_v5 = vpack.c.bf16 %v885_v37, %v881_v31  ;;  %v889_v8 = vld [vmem:[#allocation9 + $0x7c8] sm:$0xff]  ;;  %v2003_v10 = vpack.c.bf16 %v884_v3, %v880_v2  ;;  %v888_v12 = vld [vmem:[#allocation9 + $0x7c0] sm:$0xff] }
 0x1f1   : > { %1974 = vmatprep.subr.bf16.mxu0 %v1973_v36  ;;  %2230 = vmatprep.subr.bf16.mxu1 %v2229_v38  ;;  %v862_v33 = vld [vmem:[#allocation9 + $0x6f0] sm:$0xff]  ;;  %v867_v36 = vld [vmem:[#allocation9 + $0x718] sm:$0xff]  ;;  %v893_v26 = vld [vmem:[#allocation9 + $0x7e8] sm:$0xff] }
 0x1f2   : > { %v871_v38 = vld [vmem:[#allocation9 + $0x738] sm:$0xff]  ;;  %v2247_v40 = vpack.c.bf16 %v862_v33, %v858_v32  ;;  %v892_v13 = vld [vmem:[#allocation9 + $0x7e0] sm:$0xff]  ;;  %v2005_v63 = vpack.c.bf16 %v893_v26, %v889_v8  ;;  %v897_v41 = vld [vmem:[#allocation9 + $0x808] sm:$0xff] }
 0x1f3   : > { %v2249_v45 = vpack.c.bf16 %v871_v38, %v867_v36  ;;  %v901_v42 = vld [vmem:[#allocation9 + $0x828] sm:$0xff]  ;;  %v2007_v32 = vpack.c.bf16 %v892_v13, %v888_v12  ;;  %v896_v36 = vld [vmem:[#allocation9 + $0x800] sm:$0xff] }
 0x1f4   : > { %1976 = vmatpush1.bf16.msra.mxu0 %v1975_v46  ;;  %2232 = vmatpush1.bf16.msra.mxu1 %v2231_v47  ;;  %v866_v46 = vld [vmem:[#allocation9 + $0x710] sm:$0xff]  ;;  %v2009_v34 = vpack.c.bf16 %v901_v42, %v897_v41  ;;  %v900_v38 = vld [vmem:[#allocation9 + $0x820] sm:$0xff]  ;;  %v905_v43 = vld [vmem:[#allocation9 + $0x848] sm:$0xff] }
 0x1f5   : > { %1978 = vmatprep.subr.bf16.mxu0 %v1977_v24  ;;  %2234 = vmatprep.subr.bf16.mxu1 %v2233_v17  ;;  %v870_v47 = vld [vmem:[#allocation9 + $0x730] sm:$0xff]  ;;  %v875_v24 = vld [vmem:[#allocation9 + $0x758] sm:$0xff]  ;;  %v909_v44 = vld [vmem:[#allocation9 + $0x868] sm:$0xff] }
 0x1f6   : > { %v879_v17 = vld [vmem:[#allocation9 + $0x778] sm:$0xff]  ;;  %v2251_v51 = vpack.c.bf16 %v870_v47, %v866_v46  ;;  %v2011_v46 = vpack.c.bf16 %v900_v38, %v896_v36  ;;  %v634_v47 = vmax.f32 %v3019_v54, 0.0  ;;  %v904_v49 = vld [vmem:[#allocation9 + $0x840] sm:$0xff]  ;;  %v921_v2 = vld [vmem:[#allocation9 + $0x8c8] sm:$0xff] }
 0x1f7   : > { %v2253_v58 = vpack.c.bf16 %v879_v17, %v875_v24  ;;  %v908_v24 = vld [vmem:[#allocation9 + $0x860] sm:$0xff]  ;;  %v906_v17 = vld [vmem:[#allocation9 + $0x850] sm:$0xff]  ;;  %v925_v3 = vld [vmem:[#allocation9 + $0x8e8] sm:$0xff] }
 0x1f8   : > { %1980 = vmatpush1.bf16.msra.mxu0 %v1979_v19  ;;  %2236 = vmatpush1.bf16.msra.mxu1 %v2235_v59  ;;  %v874_v19 = vld [vmem:[#allocation9 + $0x750] sm:$0xff]  ;;  %v2015_v54 = vpack.c.bf16 %v908_v24, %v904_v49  ;;  %v2271_v31 = vpack.c.bf16 %v910_v52, %v906_v17  ;;  %v2021_v8 = vpack.c.bf16 %v925_v3, %v921_v2  ;;  %v920_v26 = vld [vmem:[#allocation9 + $0x8c0] sm:$0xff]  ;;  %v929_v12 = vld [vmem:[#allocation9 + $0x908] sm:$0xff] }
 0x1f9   : > { %1982 = vmatprep.subr.bf16.mxu0 %v1981_v60  ;;  %2238 = vmatprep.subr.bf16.mxu1 %v2237_v61  ;;  %v878_v59 = vld [vmem:[#allocation9 + $0x770] sm:$0xff]  ;;  %v883_v60 = vld [vmem:[#allocation9 + $0x798] sm:$0xff]  ;;  %v933_v13 = vld [vmem:[#allocation9 + $0x928] sm:$0xff] }
 0x1fa   : > { %v887_v61 = vld [vmem:[#allocation9 + $0x7b8] sm:$0xff]  ;;  %v2255_v1 = vpack.c.bf16 %v878_v59, %v874_v19  ;;  %v2025_v41 = vpack.c.bf16 %v933_v13, %v929_v12  ;;  %v928_v42 = vld [vmem:[#allocation9 + $0x900] sm:$0xff]  ;;  %v949_v49 = vld [vmem:[#allocation9 + $0x9a8] sm:$0xff] }
 0x1fb   : > { %v2257_v20 = vpack.c.bf16 %v887_v61, %v883_v60  ;;  %v915_v19 = vld [vmem:[#allocation9 + $0x898] sm:$0xff]  ;;  %v912_v60 = vld [vmem:[#allocation9 + $0x880] sm:$0xff]  ;;  %v954_v3 = vld [vmem:[#allocation9 + $0x9d0] sm:$0xff] }
 0x1fc   : > { %1984 = vmatpush1.bf16.msra.mxu0 %v1983_v7  ;;  %2240 = vmatpush1.bf16.msra.mxu1 %v2239_v6  ;;  %v882_v7 = vld [vmem:[#allocation9 + $0x790] sm:$0xff]  ;;  %v919_v59 = vld [vmem:[#allocation9 + $0x8b8] sm:$0xff]  ;;  %v916_v61 = vld [vmem:[#allocation9 + $0x8a0] sm:$0xff] }
 0x1fd   : > { %1986 = vmatprep.subr.bf16.mxu0 %v1985_v9  ;;  %2242 = vmatprep.subr.bf16.mxu1 %v2241_v27  ;;  %v886_v6 = vld [vmem:[#allocation9 + $0x7b0] sm:$0xff]  ;;  %v891_v9 = vld [vmem:[#allocation9 + $0x7d8] sm:$0xff]  ;;  %v944_v52 = vld [vmem:[#allocation9 + $0x980] sm:$0xff] }
 0x1fe   : > { %v895_v27 = vld [vmem:[#allocation9 + $0x7f8] sm:$0xff]  ;;  %v2259_v11 = vpack.c.bf16 %v886_v6, %v882_v7  ;;  %v2019_v7 = vpack.c.bf16 %v916_v61, %v912_v60  ;;  %v956_v2 = vld [vmem:[#allocation9 + $0x9e0] sm:$0xff]  ;;  %v962_v13 = vld [vmem:[#allocation9 + $0xa10] sm:$0xff] }
 0x1ff   : > { %v2261_v4 = vpack.c.bf16 %v895_v27, %v891_v9  ;;  %v924_v9 = vld [vmem:[#allocation9 + $0x8e0] sm:$0xff]  ;;  %v922_v27 = vld [vmem:[#allocation9 + $0x8d0] sm:$0xff]  ;;  %v939_v36 = vld [vmem:[#allocation9 + $0x958] sm:$0xff] }
 0x200   : > { %1988 = vmatpush1.bf16.msra.mxu0 %v1987_v25  ;;  %2244 = vmatpush1.bf16.msra.mxu1 %v2243_v29  ;;  %v890_v25 = vld [vmem:[#allocation9 + $0x7d0] sm:$0xff]  ;;  %v943_v38 = vld [vmem:[#allocation9 + $0x978] sm:$0xff]  ;;  %v964_v12 = vld [vmem:[#allocation9 + $0xa20] sm:$0xff] }
 0x201   : > { %1990 = vmatprep.subr.bf16.mxu0 %v1989_v0  ;;  %2246 = vmatprep.subr.bf16.mxu1 %v2245_v30  ;;  %v894_v29 = vld [vmem:[#allocation9 + $0x7f0] sm:$0xff]  ;;  %v899_v0 = vld [vmem:[#allocation9 + $0x818] sm:$0xff] }
 0x202   : > { %v903_v30 = vld [vmem:[#allocation9 + $0x838] sm:$0xff]  ;;  %v2263_v33 = vpack.c.bf16 %v894_v29, %v890_v25  ;;  %v2023_v25 = vpack.c.bf16 %v924_v9, %v920_v26 }
 0x203   : > { %v2265_v35 = vpack.c.bf16 %v903_v30, %v899_v0  ;;  %v932_v0 = vld [vmem:[#allocation9 + $0x920] sm:$0xff]  ;;  %v930_v30 = vld [vmem:[#allocation9 + $0x910] sm:$0xff]  ;;  %v947_v24 = vld [vmem:[#allocation9 + $0x998] sm:$0xff] }
 0x204   : > { %1992 = vmatpush1.bf16.msra.mxu0 %v1991_v39  ;;  %2248 = vmatpush1.bf16.msra.mxu1 %v2247_v40  ;;  %v898_v39 = vld [vmem:[#allocation9 + $0x810] sm:$0xff]  ;;  %v951_v17 = vld [vmem:[#allocation9 + $0x9b8] sm:$0xff] }
 0x205   : > { %1994 = vmatprep.subr.bf16.mxu0 %v1993_v28  ;;  %2250 = vmatprep.subr.bf16.mxu1 %v2249_v45  ;;  %v902_v40 = vld [vmem:[#allocation9 + $0x830] sm:$0xff]  ;;  %v907_v28 = vld [vmem:[#allocation9 + $0x858] sm:$0xff] }
 0x206   : > { %v911_v45 = vld [vmem:[#allocation9 + $0x878] sm:$0xff]  ;;  %v2267_v48 = vpack.c.bf16 %v902_v40, %v898_v39  ;;  %v2027_v39 = vpack.c.bf16 %v932_v0, %v928_v42 }
 0x207   : > { %v2269_v53 = vpack.c.bf16 %v911_v45, %v907_v28  ;;  %v940_v28 = vld [vmem:[#allocation9 + $0x960] sm:$0xff]  ;;  %v938_v45 = vld [vmem:[#allocation9 + $0x950] sm:$0xff]  ;;  %v959_v60 = vld [vmem:[#allocation9 + $0x9f8] sm:$0xff] }
 0x208   : > { %1996 = vmatpush1.bf16.msra.mxu0 %v1995_v50  ;;  %2252 = vmatpush1.bf16.msra.mxu1 %v2251_v51  ;;  %v637_v50 = vmax.f32 %v3023_v56, 0.0  ;;  %v2013_v51 = vpack.c.bf16 %v909_v44, %v905_v43  ;;  %v2273_v56 = vpack.c.bf16 %v919_v59, %v915_v19  ;;  %v936_v44 = vld [vmem:[#allocation9 + $0x940] sm:$0xff]  ;;  %v2289_v19 = vpack.c.bf16 %v951_v17, %v947_v24  ;;  %v950_v59 = vld [vmem:[#allocation9 + $0x9b0] sm:$0xff]  ;;  %v967_v26 = vld [vmem:[#allocation9 + $0xa38] sm:$0xff] }
 0x209   : > { %1998 = vmatprep.subr.bf16.mxu0 %v1997_v55  ;;  %2254 = vmatprep.subr.bf16.mxu1 %v2253_v58  ;;  %v913_v55 = vld [vmem:[#allocation9 + $0x888] sm:$0xff]  ;;  %v975_v42 = vld [vmem:[#allocation9 + $0xa78] sm:$0xff]  ;;  %v982_v17 = vld [vmem:[#allocation9 + $0xab0] sm:$0xff] }
 0x20a   : > { %v917_v58 = vld [vmem:[#allocation9 + $0x8a8] sm:$0xff] }
 0x20b   : > { %v2017_v37 = vpack.c.bf16 %v917_v58, %v913_v55  ;;  %v948_v55 = vld [vmem:[#allocation9 + $0x9a0] sm:$0xff]  ;;  %v946_v58 = vld [vmem:[#allocation9 + $0x990] sm:$0xff] }
 0x20c   : > { %2000 = vmatpush1.bf16.msra.mxu0 %v1999_v62  ;;  %2256 = vmatpush1.bf16.msra.mxu1 %v2255_v1  ;;  %v914_v62 = vld [vmem:[#allocation9 + $0x890] sm:$0xff]  ;;  %v2035_v61 = vpack.c.bf16 %v948_v55, %v944_v52  ;;  %v991_v52 = vld [vmem:[#allocation9 + $0xaf8] sm:$0xff] }
 0x20d   : > { %2002 = vmatprep.subr.bf16.mxu0 %v2001_v5  ;;  %2258 = vmatprep.subr.bf16.mxu1 %v2257_v20  ;;  %v918_v1 = vld [vmem:[#allocation9 + $0x8b0] sm:$0xff]  ;;  %v923_v5 = vld [vmem:[#allocation9 + $0x8d8] sm:$0xff] }
 0x20e   : > { %v927_v20 = vld [vmem:[#allocation9 + $0x8f8] sm:$0xff]  ;;  %v2275_v6 = vpack.c.bf16 %v918_v1, %v914_v62  ;;  %v2291_v62 = vpack.c.bf16 %v950_v59, %v946_v58  ;;  %v952_v1 = vld [vmem:[#allocation9 + $0x9c0] sm:$0xff] }
 0x20f   : > { %v2039_v9 = vpack.c.bf16 %v956_v2, %v952_v1  ;;  %v984_v59 = vld [vmem:[#allocation9 + $0xac0] sm:$0xff]  ;;  %v999_v1 = vld [vmem:[#allocation9 + $0xb38] sm:$0xff] }
 0x210   : > { %2004 = vmatpush1.bf16.msra.mxu0 %v2003_v10  ;;  %2260 = vmatpush1.bf16.msra.mxu1 %v2259_v11  ;;  %v2277_v10 = vpack.c.bf16 %v927_v20, %v923_v5  ;;  %v926_v11 = vld [vmem:[#allocation9 + $0x8f0] sm:$0xff] }
 0x211   : > { %2006 = vmatprep.subr.bf16.mxu0 %v2005_v63  ;;  %2262 = vmatprep.subr.bf16.mxu1 %v2261_v4  ;;  %v931_v63 = vld [vmem:[#allocation9 + $0x918] sm:$0xff]  ;;  %v2279_v29 = vpack.c.bf16 %v926_v11, %v922_v27  ;;  %v958_v20 = vld [vmem:[#allocation9 + $0x9f0] sm:$0xff]  ;;  %v960_v11 = vld [vmem:[#allocation9 + $0xa00] sm:$0xff] }
 0x212   : > { %v935_v4 = vld [vmem:[#allocation9 + $0x938] sm:$0xff]  ;;  %v2295_v27 = vpack.c.bf16 %v958_v20, %v954_v3  ;;  %v2043_v0 = vpack.c.bf16 %v964_v12, %v960_v11  ;;  %v992_v20 = vld [vmem:[#allocation9 + $0xb00] sm:$0xff] }
 0x213   : > { %v1007_v11 = vld [vmem:[#allocation9 + $0xb78] sm:$0xff] }
 0x214   : > { %2008 = vmatpush1.bf16.msra.mxu0 %v2007_v32  ;;  %2264 = vmatpush1.bf16.msra.mxu1 %v2263_v33  ;;  %v2281_v32 = vpack.c.bf16 %v935_v4, %v931_v63  ;;  %v934_v33 = vld [vmem:[#allocation9 + $0x930] sm:$0xff] }
 0x215   : > { %2010 = vmatprep.subr.bf16.mxu0 %v2009_v34  ;;  %2266 = vmatprep.subr.bf16.mxu1 %v2265_v35  ;;  %v937_v34 = vld [vmem:[#allocation9 + $0x948] sm:$0xff]  ;;  %v2283_v40 = vpack.c.bf16 %v934_v33, %v930_v30  ;;  %v966_v4 = vld [vmem:[#allocation9 + $0xa30] sm:$0xff]  ;;  %v968_v33 = vld [vmem:[#allocation9 + $0xa40] sm:$0xff] }
 0x216   : > { %v941_v35 = vld [vmem:[#allocation9 + $0x968] sm:$0xff]  ;;  %v2299_v30 = vpack.c.bf16 %v966_v4, %v962_v13  ;;  %v1000_v4 = vld [vmem:[#allocation9 + $0xb40] sm:$0xff] }
 0x217   : > { %1310 = vmatmul.mubr.f32.vlgmr.msra.gmra.mrb[0].mxu0 %v634_v47  ;;  %1594 = vmatmul.mubr.f32.vlgmr.msra.gmra.mrb[0].mxu1 %v634_v47  ;;  %v2029_v43 = vpack.c.bf16 %v941_v35, %v937_v34  ;;  %v942_v47 = vld [vmem:[#allocation9 + $0x970] sm:$0xff]  ;;  %v972_v34 = vld [vmem:[#allocation9 + $0xa60] sm:$0xff] }
 0x218   : > { %2012 = vmatpush1.bf16.msra.mxu0 %v2011_v46  ;;  %1380 = vmatprep.mubr.f32.mxu0 %v637_v50  ;;  %v2285_v46 = vpack.c.bf16 %v943_v38, %v939_v36  ;;  %v970_v35 = vld [vmem:[#allocation9 + $0xa50] sm:$0xff] }
 0x219   : > { %2268 = vmatpush1.bf16.msra.mxu1 %v2267_v48  ;;  %1664 = vmatprep.mubr.f32.mxu1 %v637_v50  ;;  %v945_v48 = vld [vmem:[#allocation9 + $0x988] sm:$0xff]  ;;  %v2031_v50 = vpack.c.bf16 %v940_v28, %v936_v44  ;;  %v974_v38 = vld [vmem:[#allocation9 + $0xa70] sm:$0xff]  ;;  %v983_v44 = vld [vmem:[#allocation9 + $0xab8] sm:$0xff]  ;;  %v2047_v28 = vpack.c.bf16 %v972_v34, %v968_v33 }
 0x21a   : > { %2014 = vmatprep.subr.bf16.mxu0 %v2013_v51  ;;  %2270 = vmatprep.subr.bf16.mxu1 %v2269_v53  ;;  %v2287_v51 = vpack.c.bf16 %v942_v47, %v938_v45  ;;  %v2033_v53 = vpack.c.bf16 %v949_v49, %v945_v48  ;;  %v2303_v45 = vpack.c.bf16 %v974_v38, %v970_v35  ;;  %v976_v47 = vld [vmem:[#allocation9 + $0xa80] sm:$0xff]  ;;  %v978_v49 = vld [vmem:[#allocation9 + $0xa90] sm:$0xff]  ;;  %v1015_v33 = vld [vmem:[#allocation9 + $0xbb8] sm:$0xff] }
 0x21b   : > { %v980_v48 = vld [vmem:[#allocation9 + $0xaa0] sm:$0xff]  ;;  %v2307_v58 = vpack.c.bf16 %v982_v17, %v978_v49 }
 0x21c   : > { %2016 = vmatpush1.bf16.msra.mxu0 %v2015_v54  ;;  %v953_v54 = vld [vmem:[#allocation9 + $0x9c8] sm:$0xff]  ;;  %v2051_v55 = vpack.c.bf16 %v980_v48, %v976_v47  ;;  %v1008_v38 = vld [vmem:[#allocation9 + $0xb80] sm:$0xff]  ;;  %v1023_v47 = vld [vmem:[#allocation9 + $0xbf8] sm:$0xff] }
 0x21d   : > { %2272 = vmatpush1.bf16.msra.mxu1 %v2271_v31  ;;  %2018 = vmatprep.subr.bf16.mxu0 %v2017_v37  ;;  %v957_v31 = vld [vmem:[#allocation9 + $0x9e8] sm:$0xff]  ;;  %v955_v37 = vld [vmem:[#allocation9 + $0x9d8] sm:$0xff]  ;;  %v1016_v17 = vld [vmem:[#allocation9 + $0xbc0] sm:$0xff] }
 0x21e   : > { %2274 = vmatprep.subr.bf16.mxu1 %v2273_v56  ;;  %v2037_v56 = vpack.c.bf16 %v957_v31, %v953_v54  ;;  %v2293_v5 = vpack.c.bf16 %v959_v60, %v955_v37  ;;  %v988_v54 = vld [vmem:[#allocation9 + $0xae0] sm:$0xff]  ;;  %v986_v31 = vld [vmem:[#allocation9 + $0xad0] sm:$0xff] }
 0x21f   : > { %v990_v60 = vld [vmem:[#allocation9 + $0xaf0] sm:$0xff]  ;;  %v2055_v2 = vpack.c.bf16 %v988_v54, %v984_v59  ;;  %v1031_v59 = vld [vmem:[#allocation9 + $0xc38] sm:$0xff] }
 0x220   : > { %2020 = vmatpush1.bf16.msra.mxu0 %v2019_v7  ;;  %v961_v7 = vld [vmem:[#allocation9 + $0xa08] sm:$0xff]  ;;  %v2311_v3 = vpack.c.bf16 %v990_v60, %v986_v31  ;;  %v1024_v60 = vld [vmem:[#allocation9 + $0xc00] sm:$0xff] }
 0x221   : > { %2276 = vmatpush1.bf16.msra.mxu1 %v2275_v6  ;;  %2022 = vmatprep.subr.bf16.mxu0 %v2021_v8  ;;  %v965_v6 = vld [vmem:[#allocation9 + $0xa28] sm:$0xff]  ;;  %v963_v8 = vld [vmem:[#allocation9 + $0xa18] sm:$0xff] }
 0x222   : > { %2278 = vmatprep.subr.bf16.mxu1 %v2277_v10  ;;  %v2041_v10 = vpack.c.bf16 %v965_v6, %v961_v7  ;;  %v2297_v63 = vpack.c.bf16 %v967_v26, %v963_v8  ;;  %v996_v7 = vld [vmem:[#allocation9 + $0xb20] sm:$0xff]  ;;  %v994_v6 = vld [vmem:[#allocation9 + $0xb10] sm:$0xff] }
 0x223   : > { %v998_v26 = vld [vmem:[#allocation9 + $0xb30] sm:$0xff]  ;;  %v2059_v12 = vpack.c.bf16 %v996_v7, %v992_v20  ;;  %v1035_v20 = vld [vmem:[#allocation9 + $0xc58] sm:$0xff] }
 0x224   : > { %2024 = vmatpush1.bf16.msra.mxu0 %v2023_v25  ;;  %v969_v25 = vld [vmem:[#allocation9 + $0xa48] sm:$0xff]  ;;  %v2315_v13 = vpack.c.bf16 %v998_v26, %v994_v6  ;;  %v1039_v7 = vld [vmem:[#allocation9 + $0xc78] sm:$0xff]  ;;  %v636_v6 = vmax.f32 %v3032_v14, 0.0  ;;  %v1032_v26 = vld [vmem:[#allocation9 + $0xc40] sm:$0xff] }
 0x225   : > { %2280 = vmatpush1.bf16.msra.mxu1 %v2279_v29  ;;  %2026 = vmatprep.subr.bf16.mxu0 %v2025_v41  ;;  %v973_v29 = vld [vmem:[#allocation9 + $0xa68] sm:$0xff]  ;;  %v971_v41 = vld [vmem:[#allocation9 + $0xa58] sm:$0xff] }
 0x226   : > { %2282 = vmatprep.subr.bf16.mxu1 %v2281_v32  ;;  %v2045_v32 = vpack.c.bf16 %v973_v29, %v969_v25  ;;  %v2301_v36 = vpack.c.bf16 %v975_v42, %v971_v41  ;;  %v1004_v25 = vld [vmem:[#allocation9 + $0xb60] sm:$0xff]  ;;  %v1002_v29 = vld [vmem:[#allocation9 + $0xb50] sm:$0xff] }
 0x227   : > { %v1006_v42 = vld [vmem:[#allocation9 + $0xb70] sm:$0xff]  ;;  %v2063_v34 = vpack.c.bf16 %v1004_v25, %v1000_v4  ;;  %v2333_v4 = vpack.c.bf16 %v1039_v7, %v1035_v20  ;;  %v1043_v25 = vld [vmem:[#allocation9 + $0xc98] sm:$0xff]  ;;  %v1073_v7 = vld [vmem:[#allocation9 + $0xd88] sm:$0xff] }
 0x228   : > { %2028 = vmatpush1.bf16.msra.mxu0 %v2027_v39  ;;  %v977_v39 = vld [vmem:[#allocation9 + $0xa88] sm:$0xff]  ;;  %v2319_v35 = vpack.c.bf16 %v1006_v42, %v1002_v29  ;;  %v1047_v29 = vld [vmem:[#allocation9 + $0xcb8] sm:$0xff]  ;;  %v1070_v20 = vld [vmem:[#allocation9 + $0xd70] sm:$0xff] }
 0x229   : > { %2284 = vmatpush1.bf16.msra.mxu1 %v2283_v40  ;;  %2030 = vmatprep.subr.bf16.mxu0 %v2029_v43  ;;  %v981_v40 = vld [vmem:[#allocation9 + $0xaa8] sm:$0xff]  ;;  %v979_v43 = vld [vmem:[#allocation9 + $0xa98] sm:$0xff] }
 0x22a   : > { %2286 = vmatprep.subr.bf16.mxu1 %v2285_v46  ;;  %v2049_v46 = vpack.c.bf16 %v981_v40, %v977_v39  ;;  %v2305_v24 = vpack.c.bf16 %v983_v44, %v979_v43  ;;  %v1012_v39 = vld [vmem:[#allocation9 + $0xba0] sm:$0xff]  ;;  %v1010_v40 = vld [vmem:[#allocation9 + $0xb90] sm:$0xff] }
 0x22b   : > { %v1014_v44 = vld [vmem:[#allocation9 + $0xbb0] sm:$0xff]  ;;  %v2067_v48 = vpack.c.bf16 %v1012_v39, %v1008_v38  ;;  %v1055_v38 = vld [vmem:[#allocation9 + $0xcf8] sm:$0xff] }
 0x22c   : > { %2032 = vmatpush1.bf16.msra.mxu0 %v2031_v50  ;;  %v985_v50 = vld [vmem:[#allocation9 + $0xac8] sm:$0xff]  ;;  %v2323_v49 = vpack.c.bf16 %v1014_v44, %v1010_v40  ;;  %v1048_v44 = vld [vmem:[#allocation9 + $0xcc0] sm:$0xff] }
 0x22d   : > { %2288 = vmatpush1.bf16.msra.mxu1 %v2287_v51  ;;  %2034 = vmatprep.subr.bf16.mxu0 %v2033_v53  ;;  %v989_v51 = vld [vmem:[#allocation9 + $0xae8] sm:$0xff]  ;;  %v987_v53 = vld [vmem:[#allocation9 + $0xad8] sm:$0xff] }
 0x22e   : > { %2290 = vmatprep.subr.bf16.mxu1 %v2289_v19  ;;  %v2053_v19 = vpack.c.bf16 %v989_v51, %v985_v50  ;;  %v2309_v37 = vpack.c.bf16 %v991_v52, %v987_v53  ;;  %v1020_v50 = vld [vmem:[#allocation9 + $0xbe0] sm:$0xff]  ;;  %v1018_v51 = vld [vmem:[#allocation9 + $0xbd0] sm:$0xff] }
 0x22f   : > { %v1022_v52 = vld [vmem:[#allocation9 + $0xbf0] sm:$0xff]  ;;  %v2071_v54 = vpack.c.bf16 %v1020_v50, %v1016_v17  ;;  %v1063_v17 = vld [vmem:[#allocation9 + $0xd38] sm:$0xff] }
 0x230   : > { %2036 = vmatpush1.bf16.msra.mxu0 %v2035_v61  ;;  %v993_v61 = vld [vmem:[#allocation9 + $0xb08] sm:$0xff]  ;;  %v2327_v31 = vpack.c.bf16 %v1022_v52, %v1018_v51  ;;  %v1056_v52 = vld [vmem:[#allocation9 + $0xd00] sm:$0xff] }
 0x231   : > { %2292 = vmatpush1.bf16.msra.mxu1 %v2291_v62  ;;  %2038 = vmatprep.subr.bf16.mxu0 %v2037_v56  ;;  %v997_v62 = vld [vmem:[#allocation9 + $0xb28] sm:$0xff]  ;;  %v995_v56 = vld [vmem:[#allocation9 + $0xb18] sm:$0xff] }
 0x232   : > { %2294 = vmatprep.subr.bf16.mxu1 %v2293_v5  ;;  %v2057_v5 = vpack.c.bf16 %v997_v62, %v993_v61  ;;  %v2313_v8 = vpack.c.bf16 %v999_v1, %v995_v56  ;;  %v1028_v61 = vld [vmem:[#allocation9 + $0xc20] sm:$0xff]  ;;  %v1026_v56 = vld [vmem:[#allocation9 + $0xc10] sm:$0xff] }
 0x233   : > { %v1030_v1 = vld [vmem:[#allocation9 + $0xc30] sm:$0xff] }
 0x234   : > { %2040 = vmatpush1.bf16.msra.mxu0 %v2039_v9  ;;  %v1001_v9 = vld [vmem:[#allocation9 + $0xb48] sm:$0xff] }
 0x235   : > { %2296 = vmatpush1.bf16.msra.mxu1 %v2295_v27  ;;  %2042 = vmatprep.subr.bf16.mxu0 %v2041_v10  ;;  %v1005_v27 = vld [vmem:[#allocation9 + $0xb68] sm:$0xff]  ;;  %v1003_v10 = vld [vmem:[#allocation9 + $0xb58] sm:$0xff] }
 0x236   : > { %2298 = vmatprep.subr.bf16.mxu1 %v2297_v63  ;;  %v2061_v63 = vpack.c.bf16 %v1005_v27, %v1001_v9  ;;  %v2317_v41 = vpack.c.bf16 %v1007_v11, %v1003_v10  ;;  %v1036_v9 = vld [vmem:[#allocation9 + $0xc60] sm:$0xff]  ;;  %v1034_v27 = vld [vmem:[#allocation9 + $0xc50] sm:$0xff] }
 0x237   : > { %v1038_v11 = vld [vmem:[#allocation9 + $0xc70] sm:$0xff] }
 0x238   : > { %2044 = vmatpush1.bf16.msra.mxu0 %v2043_v0  ;;  %v1009_v0 = vld [vmem:[#allocation9 + $0xb88] sm:$0xff]  ;;  %v2335_v14 = vpack.c.bf16 %v1038_v11, %v1034_v27  ;;  %v1072_v11 = vld [vmem:[#allocation9 + $0xd80] sm:$0xff] }
 0x239   : > { %2300 = vmatpush1.bf16.msra.mxu1 %v2299_v30  ;;  %2046 = vmatprep.subr.bf16.mxu0 %v2045_v32  ;;  %v1013_v30 = vld [vmem:[#allocation9 + $0xba8] sm:$0xff]  ;;  %v1011_v32 = vld [vmem:[#allocation9 + $0xb98] sm:$0xff] }
 0x23a   : > { %2302 = vmatprep.subr.bf16.mxu1 %v2301_v36  ;;  %v2065_v36 = vpack.c.bf16 %v1013_v30, %v1009_v0  ;;  %v2321_v43 = vpack.c.bf16 %v1015_v33, %v1011_v32  ;;  %v1040_v0 = vld [vmem:[#allocation9 + $0xc80] sm:$0xff]  ;;  %v1042_v32 = vld [vmem:[#allocation9 + $0xc90] sm:$0xff]  ;;  %v2337_v33 = vpack.c.bf16 %v1047_v29, %v1043_v25  ;;  %v1081_v25 = vld [vmem:[#allocation9 + $0xdc8] sm:$0xff] }
 0x23b   : > { %v1044_v30 = vld [vmem:[#allocation9 + $0xca0] sm:$0xff]  ;;  %v1085_v29 = vld [vmem:[#allocation9 + $0xde8] sm:$0xff] }
 0x23c   : > { %2048 = vmatpush1.bf16.msra.mxu0 %v2047_v28  ;;  %v1017_v28 = vld [vmem:[#allocation9 + $0xbc8] sm:$0xff]  ;;  %v2083_v39 = vpack.c.bf16 %v1044_v30, %v1040_v0  ;;  %v2101_v30 = vpack.c.bf16 %v1085_v29, %v1081_v25  ;;  %v1118_v29 = vld [vmem:[#allocation9 + $0xef0] sm:$0xff] }
 0x23d   : > { %2304 = vmatpush1.bf16.msra.mxu1 %v2303_v45  ;;  %2050 = vmatprep.subr.bf16.mxu0 %v2049_v46  ;;  %v1021_v45 = vld [vmem:[#allocation9 + $0xbe8] sm:$0xff]  ;;  %v1019_v46 = vld [vmem:[#allocation9 + $0xbd8] sm:$0xff] }
 0x23e   : > { %2306 = vmatprep.subr.bf16.mxu1 %v2305_v24  ;;  %v2069_v24 = vpack.c.bf16 %v1021_v45, %v1017_v28  ;;  %v2325_v53 = vpack.c.bf16 %v1023_v47, %v1019_v46  ;;  %v1052_v28 = vld [vmem:[#allocation9 + $0xce0] sm:$0xff]  ;;  %v1050_v45 = vld [vmem:[#allocation9 + $0xcd0] sm:$0xff] }
 0x23f   : > { %v1054_v47 = vld [vmem:[#allocation9 + $0xcf0] sm:$0xff]  ;;  %v2087_v50 = vpack.c.bf16 %v1052_v28, %v1048_v44 }
 0x240   : > { %2052 = vmatpush1.bf16.msra.mxu0 %v2051_v55  ;;  %v1025_v55 = vld [vmem:[#allocation9 + $0xc08] sm:$0xff]  ;;  %v2343_v51 = vpack.c.bf16 %v1054_v47, %v1050_v45  ;;  %v1088_v45 = vld [vmem:[#allocation9 + $0xe00] sm:$0xff]  ;;  %v1090_v47 = vld [vmem:[#allocation9 + $0xe10] sm:$0xff] }
 0x241   : > { %2308 = vmatpush1.bf16.msra.mxu1 %v2307_v58  ;;  %2054 = vmatprep.subr.bf16.mxu0 %v2053_v19  ;;  %v1029_v58 = vld [vmem:[#allocation9 + $0xc28] sm:$0xff]  ;;  %v1027_v19 = vld [vmem:[#allocation9 + $0xc18] sm:$0xff] }
 0x242   : > { %2310 = vmatprep.subr.bf16.mxu1 %v2309_v37  ;;  %v2073_v37 = vpack.c.bf16 %v1029_v58, %v1025_v55  ;;  %v2329_v62 = vpack.c.bf16 %v1031_v59, %v1027_v19  ;;  %v1060_v55 = vld [vmem:[#allocation9 + $0xd20] sm:$0xff]  ;;  %v1058_v58 = vld [vmem:[#allocation9 + $0xd10] sm:$0xff] }
 0x243   : > { %v1062_v59 = vld [vmem:[#allocation9 + $0xd30] sm:$0xff] }
 0x244   : > { %2056 = vmatpush1.bf16.msra.mxu0 %v2055_v2  ;;  %v1033_v2 = vld [vmem:[#allocation9 + $0xc48] sm:$0xff] }
 0x245   : > { %2312 = vmatpush1.bf16.msra.mxu1 %v2311_v3  ;;  %2058 = vmatprep.subr.bf16.mxu0 %v2057_v5  ;;  %v1037_v3 = vld [vmem:[#allocation9 + $0xc68] sm:$0xff]  ;;  %v2075_v5 = vpack.c.bf16 %v1028_v61, %v1024_v60  ;;  %v1071_v60 = vld [vmem:[#allocation9 + $0xd78] sm:$0xff]  ;;  %v2091_v61 = vpack.c.bf16 %v1060_v55, %v1056_v52 }
 0x246   : > { %2314 = vmatprep.subr.bf16.mxu1 %v2313_v8  ;;  %v2331_v8 = vpack.c.bf16 %v1030_v1, %v1026_v56  ;;  %v2077_v10 = vpack.c.bf16 %v1037_v3, %v1033_v2  ;;  %v1064_v1 = vld [vmem:[#allocation9 + $0xd40] sm:$0xff]  ;;  %v1066_v3 = vld [vmem:[#allocation9 + $0xd50] sm:$0xff] }
 0x247   : > { %v1068_v2 = vld [vmem:[#allocation9 + $0xd60] sm:$0xff]  ;;  %v2351_v27 = vpack.c.bf16 %v1070_v20, %v1066_v3  ;;  %v1106_v20 = vld [vmem:[#allocation9 + $0xe90] sm:$0xff] }
 0x248   : > { %2060 = vmatpush1.bf16.msra.mxu0 %v2059_v12  ;;  %v1041_v12 = vld [vmem:[#allocation9 + $0xc88] sm:$0xff]  ;;  %v1104_v3 = vld [vmem:[#allocation9 + $0xe80] sm:$0xff] }
 0x249   : > { %2316 = vmatpush1.bf16.msra.mxu1 %v2315_v13  ;;  %2062 = vmatprep.subr.bf16.mxu0 %v2061_v63  ;;  %v1045_v13 = vld [vmem:[#allocation9 + $0xca8] sm:$0xff]  ;;  %v639_v63 = vmax.f32 %v3034_v15, 0.0  ;;  %v1051_v15 = vld [vmem:[#allocation9 + $0xcd8] sm:$0xff] }
 0x24a   : > { %2318 = vmatprep.subr.bf16.mxu1 %v2317_v41  ;;  %v2079_v41 = vpack.c.bf16 %v1036_v9, %v1032_v26  ;;  %v2081_v42 = vpack.c.bf16 %v1045_v13, %v1041_v12  ;;  %v2341_v46 = vpack.c.bf16 %v1055_v38, %v1051_v15  ;;  %v1079_v26 = vld [vmem:[#allocation9 + $0xdb8] sm:$0xff]  ;;  %v2095_v9 = vpack.c.bf16 %v1068_v2, %v1064_v1  ;;  %v1076_v12 = vld [vmem:[#allocation9 + $0xda0] sm:$0xff]  ;;  %v1074_v13 = vld [vmem:[#allocation9 + $0xd90] sm:$0xff] }
 0x24b   : > { %v1089_v15 = vld [vmem:[#allocation9 + $0xe08] sm:$0xff] }
 0x24c   : > { %2064 = vmatpush1.bf16.msra.mxu0 %v2063_v34  ;;  %v1046_v34 = vld [vmem:[#allocation9 + $0xcb0] sm:$0xff]  ;;  %v1093_v38 = vld [vmem:[#allocation9 + $0xe28] sm:$0xff] }
 0x24d   : > { %2320 = vmatpush1.bf16.msra.mxu1 %v2319_v35  ;;  %2066 = vmatprep.subr.bf16.mxu0 %v2065_v36  ;;  %v1049_v35 = vld [vmem:[#allocation9 + $0xcc8] sm:$0xff]  ;;  %v2339_v40 = vpack.c.bf16 %v1046_v34, %v1042_v32  ;;  %v1080_v32 = vld [vmem:[#allocation9 + $0xdc0] sm:$0xff]  ;;  %v1082_v34 = vld [vmem:[#allocation9 + $0xdd0] sm:$0xff]  ;;  %v2105_v28 = vpack.c.bf16 %v1093_v38, %v1089_v15 }
 0x24e   : > { %2322 = vmatprep.subr.bf16.mxu1 %v2321_v43  ;;  %v1053_v36 = vld [vmem:[#allocation9 + $0xce8] sm:$0xff]  ;;  %v1126_v38 = vld [vmem:[#allocation9 + $0xf30] sm:$0xff] }
 0x24f   : > { %v2085_v43 = vpack.c.bf16 %v1053_v36, %v1049_v35  ;;  %v1086_v36 = vld [vmem:[#allocation9 + $0xdf0] sm:$0xff] }
 0x250   : > { %2068 = vmatpush1.bf16.msra.mxu0 %v2067_v48  ;;  %v1057_v48 = vld [vmem:[#allocation9 + $0xd08] sm:$0xff]  ;;  %v2359_v44 = vpack.c.bf16 %v1086_v36, %v1082_v34  ;;  %v1120_v34 = vld [vmem:[#allocation9 + $0xf00] sm:$0xff]  ;;  %v1122_v36 = vld [vmem:[#allocation9 + $0xf10] sm:$0xff] }
 0x251   : > { %2324 = vmatpush1.bf16.msra.mxu1 %v2323_v49  ;;  %2070 = vmatprep.subr.bf16.mxu0 %v2069_v24  ;;  %v1061_v49 = vld [vmem:[#allocation9 + $0xd28] sm:$0xff]  ;;  %v1059_v24 = vld [vmem:[#allocation9 + $0xd18] sm:$0xff] }
 0x252   : > { %2326 = vmatprep.subr.bf16.mxu1 %v2325_v53  ;;  %v2089_v53 = vpack.c.bf16 %v1061_v49, %v1057_v48  ;;  %v2345_v19 = vpack.c.bf16 %v1063_v17, %v1059_v24  ;;  %v1094_v49 = vld [vmem:[#allocation9 + $0xe30] sm:$0xff]  ;;  %v1097_v24 = vld [vmem:[#allocation9 + $0xe48] sm:$0xff] }
 0x253   : > { %v1101_v17 = vld [vmem:[#allocation9 + $0xe68] sm:$0xff]  ;;  %v2363_v52 = vpack.c.bf16 %v1094_v49, %v1090_v47  ;;  %v1128_v47 = vld [vmem:[#allocation9 + $0xf40] sm:$0xff]  ;;  %v1130_v49 = vld [vmem:[#allocation9 + $0xf50] sm:$0xff] }
 0x254   : > { %2072 = vmatpush1.bf16.msra.mxu0 %v2071_v54  ;;  %v1065_v54 = vld [vmem:[#allocation9 + $0xd48] sm:$0xff]  ;;  %v2109_v55 = vpack.c.bf16 %v1101_v17, %v1097_v24  ;;  %v1134_v17 = vld [vmem:[#allocation9 + $0xf70] sm:$0xff] }
 0x255   : > { %2328 = vmatpush1.bf16.msra.mxu1 %v2327_v31  ;;  %2074 = vmatprep.subr.bf16.mxu0 %v2073_v37  ;;  %v1069_v31 = vld [vmem:[#allocation9 + $0xd68] sm:$0xff]  ;;  %v1067_v37 = vld [vmem:[#allocation9 + $0xd58] sm:$0xff] }
 0x256   : > { %2330 = vmatprep.subr.bf16.mxu1 %v2329_v62  ;;  %v2347_v62 = vpack.c.bf16 %v1062_v59, %v1058_v58  ;;  %v2093_v56 = vpack.c.bf16 %v1069_v31, %v1065_v54  ;;  %v1096_v58 = vld [vmem:[#allocation9 + $0xe40] sm:$0xff]  ;;  %v1098_v59 = vld [vmem:[#allocation9 + $0xe50] sm:$0xff] }
 0x257   : > { %1381 = vmatmul.mubr.f32.vlgmr.msra.gmra.mrb[0].mxu0 %v636_v6  ;;  %v1102_v31 = vld [vmem:[#allocation9 + $0xe70] sm:$0xff] }
 0x258   : > { %1665 = vmatmul.mubr.f32.vlgmr.msra.gmra.mrb[0].mxu1 %v636_v6  ;;  %2076 = vmatpush1.bf16.msra.mxu0 %v2075_v5  ;;  %v2349_v5 = vpack.c.bf16 %v1071_v60, %v1067_v37  ;;  %v1077_v6 = vld [vmem:[#allocation9 + $0xda8] sm:$0xff]  ;;  %v2367_v1 = vpack.c.bf16 %v1102_v31, %v1098_v59  ;;  %v1136_v59 = vld [vmem:[#allocation9 + $0xf80] sm:$0xff]  ;;  %v1138_v31 = vld [vmem:[#allocation9 + $0xf90] sm:$0xff] }
 0x259   : > { %1451 = vmatprep.mubr.f32.mxu0 %v639_v63  ;;  %2332 = vmatpush1.bf16.msra.mxu1 %v2331_v8  ;;  %v1075_v8 = vld [vmem:[#allocation9 + $0xd98] sm:$0xff]  ;;  %v1105_v37 = vld [vmem:[#allocation9 + $0xe88] sm:$0xff] }
 0x25a   : > { %1735 = vmatprep.mubr.f32.mxu1 %v639_v63  ;;  %2078 = vmatprep.subr.bf16.mxu0 %v2077_v10  ;;  %v2097_v10 = vpack.c.bf16 %v1077_v6, %v1073_v7  ;;  %v2353_v63 = vpack.c.bf16 %v1079_v26, %v1075_v8  ;;  %v1109_v60 = vld [vmem:[#allocation9 + $0xea8] sm:$0xff]  ;;  %v1110_v6 = vld [vmem:[#allocation9 + $0xeb0] sm:$0xff] }
 0x25b   : > { %2334 = vmatprep.subr.bf16.mxu1 %v2333_v4  ;;  %v1078_v4 = vld [vmem:[#allocation9 + $0xdb0] sm:$0xff]  ;;  %v2113_v2 = vpack.c.bf16 %v1109_v60, %v1105_v37  ;;  %v1113_v8 = vld [vmem:[#allocation9 + $0xec8] sm:$0xff] }
 0x25c   : > { %2080 = vmatpush1.bf16.msra.mxu0 %v2079_v41  ;;  %v1083_v41 = vld [vmem:[#allocation9 + $0xdd8] sm:$0xff]  ;;  %v2355_v0 = vpack.c.bf16 %v1078_v4, %v1074_v13  ;;  %v1117_v26 = vld [vmem:[#allocation9 + $0xee8] sm:$0xff]  ;;  %v1112_v13 = vld [vmem:[#allocation9 + $0xec0] sm:$0xff] }
 0x25d   : > { %2336 = vmatpush1.bf16.msra.mxu1 %v2335_v14  ;;  %2082 = vmatprep.subr.bf16.mxu0 %v2081_v42  ;;  %v1087_v14 = vld [vmem:[#allocation9 + $0xdf8] sm:$0xff]  ;;  %v2099_v42 = vpack.c.bf16 %v1076_v12, %v1072_v11  ;;  %v2371_v11 = vpack.c.bf16 %v1110_v6, %v1106_v20  ;;  %v2117_v12 = vpack.c.bf16 %v1117_v26, %v1113_v8  ;;  %v1114_v4 = vld [vmem:[#allocation9 + $0xed0] sm:$0xff]  ;;  %v1144_v20 = vld [vmem:[#allocation9 + $0xfc0] sm:$0xff] }
 0x25e   : > { %2338 = vmatprep.subr.bf16.mxu1 %v2337_v33  ;;  %v1084_v33 = vld [vmem:[#allocation9 + $0xde0] sm:$0xff]  ;;  %v2357_v35 = vpack.c.bf16 %v1087_v14, %v1083_v41  ;;  %v1121_v41 = vld [vmem:[#allocation9 + $0xf08] sm:$0xff]  ;;  %v1142_v60 = vld [vmem:[#allocation9 + $0xfb0] sm:$0xff] }
 0x25f   : > { %v1125_v14 = vld [vmem:[#allocation9 + $0xf28] sm:$0xff]  ;;  %v1146_v8 = vld [vmem:[#allocation9 + $0xfd0] sm:$0xff] }
 0x260   : > { %2084 = vmatpush1.bf16.msra.mxu0 %v2083_v39  ;;  %v1091_v39 = vld [vmem:[#allocation9 + $0xe18] sm:$0xff]  ;;  %v1150_v26 = vld [vmem:[#allocation9 + $0xff0] sm:$0xff] }
 0x261   : > { %2340 = vmatpush1.bf16.msra.mxu1 %v2339_v40  ;;  %2086 = vmatprep.subr.bf16.mxu0 %v2085_v43  ;;  %v1095_v40 = vld [vmem:[#allocation9 + $0xe38] sm:$0xff]  ;;  %v2103_v43 = vpack.c.bf16 %v1084_v33, %v1080_v32  ;;  %v2375_v32 = vpack.c.bf16 %v1118_v29, %v1114_v4  ;;  %v2121_v33 = vpack.c.bf16 %v1125_v14, %v1121_v41 }
 0x262   : > { %2342 = vmatprep.subr.bf16.mxu1 %v2341_v46  ;;  %v1092_v46 = vld [vmem:[#allocation9 + $0xe20] sm:$0xff]  ;;  %v2361_v48 = vpack.c.bf16 %v1095_v40, %v1091_v39  ;;  %v1129_v39 = vld [vmem:[#allocation9 + $0xf48] sm:$0xff] }
 0x263   : > { %v1133_v40 = vld [vmem:[#allocation9 + $0xf68] sm:$0xff] }
 0x264   : > { %2088 = vmatpush1.bf16.msra.mxu0 %v2087_v50  ;;  %v1099_v50 = vld [vmem:[#allocation9 + $0xe58] sm:$0xff] }
 0x265   : > { %2344 = vmatpush1.bf16.msra.mxu1 %v2343_v51  ;;  %2090 = vmatprep.subr.bf16.mxu0 %v2089_v53  ;;  %v1103_v51 = vld [vmem:[#allocation9 + $0xe78] sm:$0xff]  ;;  %v2107_v53 = vpack.c.bf16 %v1092_v46, %v1088_v45  ;;  %v2379_v45 = vpack.c.bf16 %v1126_v38, %v1122_v36  ;;  %v2125_v46 = vpack.c.bf16 %v1133_v40, %v1129_v39 }
 0x266   : > { %2346 = vmatprep.subr.bf16.mxu1 %v2345_v19  ;;  %v1100_v19 = vld [vmem:[#allocation9 + $0xe60] sm:$0xff]  ;;  %v2365_v54 = vpack.c.bf16 %v1103_v51, %v1099_v50  ;;  %v1137_v50 = vld [vmem:[#allocation9 + $0xf88] sm:$0xff] }
 0x267   : > { %v1141_v51 = vld [vmem:[#allocation9 + $0xfa8] sm:$0xff] }
 0x268   : > { %2092 = vmatpush1.bf16.msra.mxu0 %v2091_v61  ;;  %v1107_v61 = vld [vmem:[#allocation9 + $0xe98] sm:$0xff] }
 0x269   : > { %2348 = vmatpush1.bf16.msra.mxu1 %v2347_v62  ;;  %2094 = vmatprep.subr.bf16.mxu0 %v2093_v56  ;;  %v1111_v62 = vld [vmem:[#allocation9 + $0xeb8] sm:$0xff]  ;;  %v2111_v56 = vpack.c.bf16 %v1100_v19, %v1096_v58  ;;  %v2383_v58 = vpack.c.bf16 %v1134_v17, %v1130_v49  ;;  %v2129_v19 = vpack.c.bf16 %v1141_v51, %v1137_v50 }
 0x26a   : > { %2350 = vmatprep.subr.bf16.mxu1 %v2349_v5  ;;  %v1108_v5 = vld [vmem:[#allocation9 + $0xea0] sm:$0xff]  ;;  %v2369_v7 = vpack.c.bf16 %v1111_v62, %v1107_v61  ;;  %v1145_v61 = vld [vmem:[#allocation9 + $0xfc8] sm:$0xff] }
 0x26b   : > { %v1149_v62 = vld [vmem:[#allocation9 + $0xfe8] sm:$0xff] }
 0x26c   : > { %2096 = vmatpush1.bf16.msra.mxu0 %v2095_v9  ;;  %v1115_v9 = vld [vmem:[#allocation9 + $0xed8] sm:$0xff] }
 0x26d   : > { %2352 = vmatpush1.bf16.msra.mxu1 %v2351_v27  ;;  %2098 = vmatprep.subr.bf16.mxu0 %v2097_v10  ;;  %v1119_v27 = vld [vmem:[#allocation9 + $0xef8] sm:$0xff]  ;;  %v2115_v10 = vpack.c.bf16 %v1108_v5, %v1104_v3  ;;  %v2387_v3 = vpack.c.bf16 %v1142_v60, %v1138_v31  ;;  %v2133_v5 = vpack.c.bf16 %v1149_v62, %v1145_v61 }
 0x26e   : > { %2354 = vmatprep.subr.bf16.mxu1 %v2353_v63  ;;  %v1116_v63 = vld [vmem:[#allocation9 + $0xee0] sm:$0xff]  ;;  %v2373_v25 = vpack.c.bf16 %v1119_v27, %v1115_v9  ;;  %v2391_v27 = vpack.c.bf16 %v1150_v26, %v1146_v8 }
 0x270   : > { %2100 = vmatpush1.bf16.msra.mxu0 %v2099_v42  ;;  %v1123_v42 = vld [vmem:[#allocation9 + $0xf18] sm:$0xff] }
 0x271   : > { %2356 = vmatpush1.bf16.msra.mxu1 %v2355_v0  ;;  %2102 = vmatprep.subr.bf16.mxu0 %v2101_v30  ;;  %v1127_v0 = vld [vmem:[#allocation9 + $0xf38] sm:$0xff]  ;;  %v2119_v30 = vpack.c.bf16 %v1116_v63, %v1112_v13 }
 0x272   : > { %2358 = vmatprep.subr.bf16.mxu1 %v2357_v35  ;;  %v1124_v35 = vld [vmem:[#allocation9 + $0xf20] sm:$0xff]  ;;  %v2377_v15 = vpack.c.bf16 %v1127_v0, %v1123_v42 }
 0x274   : > { %2104 = vmatpush1.bf16.msra.mxu0 %v2103_v43  ;;  %v1131_v43 = vld [vmem:[#allocation9 + $0xf58] sm:$0xff] }
 0x275   : > { %2360 = vmatpush1.bf16.msra.mxu1 %v2359_v44  ;;  %2106 = vmatprep.subr.bf16.mxu0 %v2105_v28  ;;  %v1135_v44 = vld [vmem:[#allocation9 + $0xf78] sm:$0xff]  ;;  %v2123_v28 = vpack.c.bf16 %v1124_v35, %v1120_v34 }
 0x276   : > { %2362 = vmatprep.subr.bf16.mxu1 %v2361_v48  ;;  %v1132_v48 = vld [vmem:[#allocation9 + $0xf60] sm:$0xff]  ;;  %v2381_v24 = vpack.c.bf16 %v1135_v44, %v1131_v43 }
 0x278   : > { %2108 = vmatpush1.bf16.msra.mxu0 %v2107_v53  ;;  %v1139_v53 = vld [vmem:[#allocation9 + $0xf98] sm:$0xff] }
 0x279   : > { %2364 = vmatpush1.bf16.msra.mxu1 %v2363_v52  ;;  %2110 = vmatprep.subr.bf16.mxu0 %v2109_v55  ;;  %v1143_v52 = vld [vmem:[#allocation9 + $0xfb8] sm:$0xff]  ;;  %v2127_v55 = vpack.c.bf16 %v1132_v48, %v1128_v47 }
 0x27a   : > { %2366 = vmatprep.subr.bf16.mxu1 %v2365_v54  ;;  %v1140_v54 = vld [vmem:[#allocation9 + $0xfa0] sm:$0xff]  ;;  %v2385_v37 = vpack.c.bf16 %v1143_v52, %v1139_v53 }
 0x27c   : > { %2112 = vmatpush1.bf16.msra.mxu0 %v2111_v56  ;;  %v1147_v56 = vld [vmem:[#allocation9 + $0xfd8] sm:$0xff] }
 0x27d   : > { %2368 = vmatpush1.bf16.msra.mxu1 %v2367_v1  ;;  %2114 = vmatprep.subr.bf16.mxu0 %v2113_v2  ;;  %v1151_v1 = vld [vmem:[#allocation9 + $0xff8] sm:$0xff]  ;;  %v2131_v2 = vpack.c.bf16 %v1140_v54, %v1136_v59 }
 0x27e   : > { %2370 = vmatprep.subr.bf16.mxu1 %v2369_v7  ;;  %v1148_v7 = vld [vmem:[#allocation9 + $0xfe0] sm:$0xff]  ;;  %v2389_v6 = vpack.c.bf16 %v1151_v1, %v1147_v56 }
 0x27f   : > { %v2135_v9 = vpack.c.bf16 %v1148_v7, %v1144_v20 }
 0x280   : > { %2116 = vmatpush1.bf16.msra.mxu0 %v2115_v10  ;;  %v638_v10 = vmax.f32 %v3038_v21, 0.0 }
 0x281   : > { %2372 = vmatpush1.bf16.msra.mxu1 %v2371_v11  ;;  %2118 = vmatprep.subr.bf16.mxu0 %v2117_v12  ;;  %v1152_v11 = vld [vmem:[#allocation10] sm:$0xf]  ;;  %v2680_v12 = vmov 1983009808  }
 0x282   : > { %2374 = vmatprep.subr.bf16.mxu1 %v2373_v25  ;;  %v1749_v13 = vunpack.c.l.s4 %v2680_v12  ;;  %v1157_v63 = vrot.slane %v1152_v11, %v2907_v18  ;;  %v1165_v4 = vrot.slane %v1152_v11, %v2916_v22  ;;  %v1161_v25 = vrot.slane %v1152_v11, %v2902_v16 }
 0x283   : > { %v1169_v41 = vrot.slane %v1152_v11, %v2919_v23 }
 0x284   : > { %2120 = vmatpush1.bf16.msra.mxu0 %v2119_v30  ;;  %v1750_v29 = vunpack.c.0.s8 %v1749_v13 }
 0x285   : > { %2376 = vmatpush1.bf16.msra.mxu1 %v2375_v32  ;;  %2122 = vmatprep.subr.bf16.mxu0 %v2121_v33 }
 0x286   : > { %2378 = vmatprep.subr.bf16.mxu1 %v2377_v15  ;;  %v1753_v33 = vsub.s32 %v1750_v29, %v2895_v57 }
 0x288   : > { %2124 = vmatpush1.bf16.msra.mxu0 %v2123_v28 }
 0x289   : > { %2380 = vmatpush1.bf16.msra.mxu1 %v2379_v45  ;;  %2126 = vmatprep.subr.bf16.mxu0 %v2125_v46 }
 0x28a   : > { %2382 = vmatprep.subr.bf16.mxu1 %v2381_v24 }
 0x28c   : > { %2128 = vmatpush1.bf16.msra.mxu0 %v2127_v55 }
 0x28d   : > { %2384 = vmatpush1.bf16.msra.mxu1 %v2383_v58  ;;  %2130 = vmatprep.subr.bf16.mxu0 %v2129_v19 }
 0x28e   : > { %2386 = vmatprep.subr.bf16.mxu1 %v2385_v37 }
 0x290   : > { %2132 = vmatpush1.bf16.msra.mxu0 %v2131_v2 }
 0x291   : > { %2388 = vmatpush1.bf16.msra.mxu1 %v2387_v3  ;;  %2134 = vmatprep.subr.bf16.mxu0 %v2133_v5 }
 0x292   : > { %2390 = vmatprep.subr.bf16.mxu1 %v2389_v6 }
 0x294   : > { %2136 = vmatpush1.bf16.msra.mxu0 %v2135_v9 }
 0x295   : > { %2392 = vmatpush1.bf16.msra.mxu1 %v2391_v27 }
 0x297   : > { %1452 = vmatmul.mubr.f32.vlgmr.msra.gmra.mrb[0].mxu0 %v638_v10 }
 0x298   : > { %1736 = vmatmul.mubr.f32.vlgmr.msra.gmra.mrb[0].mxu1 %v638_v10 }
 0x36a   : > { %v1453_v14 = vpop.f32.mrb[0].mxu0 }
 0x36b   : > { %v2393_v42 = vadd.f32 %v1453_v14, %v1157_v63  ;;  %v1737_v0 = vpop.f32.mrb[0].mxu1  ;;  %v1455_v30 = vpop.f32.mrb[1].mxu0 }
 0x36c   : > { %v2395_v32 = vadd.f32 %v1737_v0, %v1165_v4  ;;  %v2394_v21 = vadd.f32 %v1455_v30, %v1161_v25  ;;  %v1739_v34 = vpop.f32.mrb[1].mxu1 }
 0x36d   : > { %v2396_v35 = vadd.f32 %v1739_v34, %v1169_v41 }
 0x36e   : > { %v1746_v36 = vcombine.low %v2393_v42, %v2394_v21 }
 0x36f   : > { %v1747_v15 = vcombine.low %v2395_v32, %v2396_v35 }
 0x370   : > { %v1754_v18 = vrot.slane %v1746_v36, %v1753_v33 }
 0x371   : > { %v1761_v38 = vrot.slane %v1747_v15, %v1753_v33 }
 0x373   : > { %v1762_v22 = vcombine.low %v1754_v18, %v1761_v38 }
 0x375   : > { %1764 = vst [vmem:[#allocation12] sm:$0xff] %v1762_v22 }
 0x376 PF: > { %p2450_p3 = scmp.eq.s32.totalorder %s2728_s21, 1  ;;  %s2681_s18 = smov [#allocation12]  }
 0x377   : > { %s1772_s27 = sshll.u32 %s2681_s18, 4  ;;  %s1773_s27 = int_to_ptr.vmem [resolvable:$true] %s1772_s27 }
 0x378   : > { %s2604_s24 = scalar_lea.vmem %s1773_s27, 128  ;;  %p2611_p13 = scmp.lt.s32.totalorder %s1773_s27, %s1773_s27 }
 0x379   : > { %p2605_p5 = scmp.ne.s32.totalorder %s1773_s27, %s2604_s24  ;;  %p2612_p10 = scmp.lt.s32.totalorder %s2604_s24, %s2604_s24 }
 0x37b   : > { %p2606_p9 = pnand %p2605_p5, %p2450_p3  ;;  %p2613_p12 = por %p2612_p10, %p2611_p13 }
 0x37d   : > { %p2607_p11 = pneg %p2606_p9 }
 0x37f   : > { %p2614_p6 = pnand %p2613_p12, %p2607_p11 }
 0x381   : > { %2617 = shalt.err (!%p2614_p6)
}
 0x382   : > { %s2618_s8 = scalar_lea.hbm %s3088_s5, 128 }
 0x383   : > { %p2619_p4 = scmp.ne.s32.totalorder %s3088_s5, %s2618_s8  ;;  %p2624_p0 = scmp.lt.u32.totalorder %s2618_s8, %s3088_s5 }
 0x385   : > { %p2620_p7 = pnand %p2619_p4, %p2450_p3 }
 0x387   : > { %p2621_p8 = pneg %p2620_p7 }
 0x389   : > { %p2626_p1 = pnand %p2624_p0, %p2621_p8 }
 0x38b   : > { %2629 = shalt.err (!%p2626_p1)
}
 0x38c   : > { %2426 = dma.vmem_to_hbm [thread:$0]  (%p2450_p3), %s1773_s27, 128, %s3088_s5, [#allocation6]  }
 0x38d   : > { %2655 = dma.done.wait (%p2450_p3), [#allocation6], 128  }
 0x38e   : > { %2657 = vsyncadd (%p2450_p3), [#allocation6], 4294967168 }
 0x38f PF: > { %p16_p2 = scmp.ge.s32.totalorder %s2731_s22, 4   ;;  %s3104_s18 = smov %s2664_s19 }
 0x390   : > { %s3105_s19 = smov %s2741_s25  ;;  %s3106_s20 = smov %s2731_s22 }
 0x391   :  { %18 = sbr.rel (!%p16_p2) target bundleno = 5 (0x5), region = 122 }
 0x398   :  { %1785 = vsyncpa [#allocation5], 1 }
 0x399   :  { %1787 = vsyncpa [#allocation5 + $0x1], 1 }
 0x39a   :  { %1788 = vsyncpa [#allocation8], 1 }
 0x39b   :  { %1789 = vsyncpa [#allocation11], 1 }
 0x39c   :  { %1790 = vsyncpa [#allocation6], 1 }
 0x39d   :  { %1792 = vsyncpa [#allocation6 + $0x1], 1 }

</bundles_post_ra>
